<compile_context>
chip_gen: v7x
topology: tpu7x:2x2x1
jax: 0.10.0
libtpu: 0.0.40
codegen_flags: <defaults>
</compile_context>

<pallas_src>
import functools

import jax
import jax.numpy as jnp
from jax.experimental import pallas as pl
from jax.experimental.pallas import tpu as pltpu


# ----------------------------------------------------------------------------
# Kernel
# ----------------------------------------------------------------------------
def mha_kernel(x_ref, y_ref, wq_ref, bq_ref, wkv_ref, bkv_ref,
               wproj_ref, bproj_ref, out_ref, attn_ref,
               *, num_heads, matmul_dtype):
    """Fused MHA for one (batch, query-tile) grid step.

    x_ref: (TN, C), y_ref: (M, D).
    wq_ref: (C, C)  [pre-scaled by head_dim**-0.5], bq_ref: (1, C) [pre-scaled],
    wkv_ref: (D, 2C), bkv_ref: (1, 2C), wproj_ref: (C, C), bproj_ref: (1, C).
    Outputs: out_ref (TN, C), attn_ref (H, TN, M)  [lane-dense, keys on lanes].
    """
    md = matmul_dtype
    f32 = jnp.float32
    h = num_heads

    x = x_ref[...]                                 # (TN, C)
    y = y_ref[...]                                 # (M, D)
    tn, c = x.shape
    m = y.shape[0]
    dh = c // h

    # --- full-width input projections (single MXU matmuls, f32 accumulate) ---
    # scale is already folded into wq/bq by the wrapper.
    q2d = jnp.dot(x.astype(md), wq_ref[...].astype(md),
                  preferred_element_type=f32) + bq_ref[...]        # (TN, C)
    kv2d = jnp.dot(y.astype(md), wkv_ref[...].astype(md),
                   preferred_element_type=f32) + bkv_ref[...]      # (M, 2C)

    # --- split heads (layout-only reshape + transpose, h-major like torch) ---
    qh = jnp.transpose(q2d.reshape(tn, h, dh), (1, 0, 2))          # (H, TN, Dh)
    kh = jnp.transpose(kv2d[:, :c].reshape(m, h, dh), (1, 0, 2))   # (H, M, Dh)
    vh = jnp.transpose(kv2d[:, c:].reshape(m, h, dh), (1, 0, 2))   # (H, M, Dh)

    # --- scaled dot-product attention; exact softmax over keys (last dim) ---
    # TODO(synk): optional attention mask (masked_fill) not implemented;
    #             reference default is mask=None.
    att = jnp.einsum('hne,hme->hnm', qh.astype(md), kh.astype(md),
                     preferred_element_type=f32)                   # (H, TN, M)
    att = att - jnp.max(att, axis=-1, keepdims=True)
    att = jnp.exp(att)
    att = att / jnp.sum(att, axis=-1, keepdims=True)               # exact norm

    ctx = jnp.einsum('hnm,hme->hne', att.astype(md), vh.astype(md),
                     preferred_element_type=f32)                   # (H, TN, Dh)

    # --- merge heads and do ONE full-depth output projection ---
    ctx2d = jnp.transpose(ctx, (1, 0, 2)).reshape(tn, c)           # (TN, C)
    out = jnp.dot(ctx2d.astype(md), wproj_ref[...].astype(md),
                  preferred_element_type=f32) + bproj_ref[...]     # (TN, C)

    out_ref[...] = out.astype(out_ref.dtype)
    attn_ref[...] = att.astype(attn_ref.dtype)                     # (H, TN, M)


# ----------------------------------------------------------------------------
# Wrapper
# ----------------------------------------------------------------------------
def _pick_tile_n(n):
    """Largest convenient query tile (keeps second-to-last dims 8-aligned)."""
    for t in (256, 128):
        if n % t == 0:
            return t
    return n  # small N: one tile covering the full axis


def multi_head_attention(x, params, y=None, *, num_heads,
                         matmul_dtype=jnp.bfloat16, attn_layout="bnmh"):
    """Matches MultiHeadAttention.forward(x, y=None, mask=None) -> (out, att).

    attn_layout: "bnmh" (reference layout, default) or "bhnm" (kernel-native,
    lane-dense; skips the wrapper transpose for large attention tensors).
    """
    if y is None:
        y = x
    B, N, C = x.shape
    _, M, D = y.shape
    H = num_heads
    Dh = C // H
    scale = float(Dh) ** -0.5

    # One-time parameter prep (layout plumbing outside the kernel; in a real
    # model this is done once at load time).  Scale folded into Wq / bq.
    wq = params["wq"] * scale                                  # (C, C)
    bq = params["bq"] * scale                                  # (1, C)
    wkv = params["wkv"]                                        # (D, 2C)
    bkv = params["bkv"]                                        # (1, 2C)
    wproj = params["wproj"]                                    # (C, C)
    bproj = params["bproj"]                                    # (1, C)

    TILE_N = _pick_tile_n(N)
    nt = N // TILE_N

    kern = functools.partial(mha_kernel, num_heads=H, matmul_dtype=matmul_dtype)

    out, attn_hnm = pl.pallas_call(
        kern,
        out_shape=(jax.ShapeDtypeStruct((B, N, C), x.dtype),
                   jax.ShapeDtypeStruct((B, H, N, M), jnp.float32)),
        grid=(B, nt),
        in_specs=[
            pl.BlockSpec((None, TILE_N, C), lambda b, i: (b, i, 0)),   # x tile
            pl.BlockSpec((None, M, D), lambda b, i: (b, 0, 0)),        # y (full)
            pl.BlockSpec((C, C), lambda b, i: (0, 0)),                 # wq (scaled)
            pl.BlockSpec((1, C), lambda b, i: (0, 0)),                 # bq (scaled)
            pl.BlockSpec((D, 2 * C), lambda b, i: (0, 0)),             # wkv
            pl.BlockSpec((1, 2 * C), lambda b, i: (0, 0)),             # bkv
            pl.BlockSpec((C, C), lambda b, i: (0, 0)),                 # wproj
            pl.BlockSpec((1, C), lambda b, i: (0, 0)),                 # bproj
        ],
        out_specs=(
            pl.BlockSpec((None, TILE_N, C), lambda b, i: (b, i, 0)),
            pl.BlockSpec((None, H, TILE_N, M), lambda b, i: (b, 0, i, 0)),
        ),
        compiler_params=pltpu.CompilerParams(
            dimension_semantics=("parallel", "parallel"),
            vmem_limit_bytes=64 * 1024 * 1024),
    )(x, y, wq, bq, wkv, bkv, wproj, bproj)

    if attn_layout == "bhnm":
        return out, attn_hnm
    # Reference layout (B, N, M, H): permute the kernel-native (B, H, N, M).
    return out, jnp.transpose(attn_hnm, (0, 2, 3, 1))


# ----------------------------------------------------------------------------
# Deterministic parameter init (weights pre-transposed as [in, out])
# ----------------------------------------------------------------------------
def init_params(key, *, dim_self, dim_ref):
    ks = jax.random.split(key, 6)

    def rnd(k, shape, s=0.02):
        return s * jax.random.normal(k, shape, dtype=jnp.float32)

    return dict(
        wq=rnd(ks[0], (dim_self, dim_self)),
        bq=rnd(ks[1], (1, dim_self)),
        wkv=rnd(ks[2], (dim_ref, 2 * dim_self)),
        bkv=rnd(ks[3], (1, 2 * dim_self)),
        wproj=rnd(ks[4], (dim_self, dim_self)),
        bproj=rnd(ks[5], (1, dim_self)),
    )


# ----------------------------------------------------------------------------
# Pure-JAX reference (same math as the PyTorch module, mask=None)
# ----------------------------------------------------------------------------
def mha_reference(x, y, params, *, num_heads):
    B, N, C = x.shape
    M = y.shape[1]
    H = num_heads
    Dh = C // H
    scale = float(Dh) ** -0.5
    q = (x @ params["wq"] + params["bq"]).reshape(B, N, H, Dh)
    kv = (y @ params["wkv"] + params["bkv"]).reshape(B, M, 2, H, Dh)
    k, v = kv[:, :, 0], kv[:, :, 1]
    att = jnp.einsum('bnhd,bmhd->bnmh', q, k) * scale
    att = jax.nn.softmax(att, axis=2)
    out = jnp.einsum('bnmh,bmhd->bnhd', att, v).reshape(B, N, C)
    out = out @ params["wproj"] + params["bproj"]
    return out, att


# ----------------------------------------------------------------------------
# Main
# ----------------------------------------------------------------------------
if __name__ == "__main__":
    B = 2            # batch
    N = 8            # query sequence length
    M = 8            # key/value sequence length
    DIM_SELF = 128   # dim_self (lane-aligned)
    DIM_REF = 64     # dim_ref (cross-attention reference dim)
    NUM_HEADS = 8    # head_dim = 16

    key = jax.random.PRNGKey(0)
    kp, kx, ky = jax.random.split(key, 3)

    params = init_params(kp, dim_self=DIM_SELF, dim_ref=DIM_REF)
    x = jax.random.normal(kx, (B, N, DIM_SELF), dtype=jnp.float32)
    y = jax.random.normal(ky, (B, M, DIM_REF), dtype=jnp.float32)

    out_ref, att_ref = mha_reference(x, y, params, num_heads=NUM_HEADS)

    # Default path: bf16 MXU operands, f32 accumulation.
    out, attention = multi_head_attention(x, params, y, num_heads=NUM_HEADS)
    jax.block_until_ready((out, attention))

    assert out.shape == (B, N, DIM_SELF)
    assert attention.shape == (B, N, M, NUM_HEADS)
    assert bool(jnp.allclose(out, out_ref, rtol=2e-2, atol=2e-2)), \
        float(jnp.max(jnp.abs(out - out_ref)))
    assert bool(jnp.allclose(attention, att_ref, rtol=2e-2, atol=2e-2)), \
        float(jnp.max(jnp.abs(attention - att_ref)))

    # f32-operand path: tight correctness check of the kernel math.
    out32, att32 = multi_head_attention(x, params, y, num_heads=NUM_HEADS,
                                        matmul_dtype=jnp.float32)
    jax.block_until_ready((out32, att32))
    assert bool(jnp.allclose(out32, out_ref, rtol=1e-2, atol=5e-3)), \
        float(jnp.max(jnp.abs(out32 - out_ref)))
    assert bool(jnp.allclose(att32, att_ref, rtol=1e-2, atol=5e-3)), \
        float(jnp.max(jnp.abs(att32 - att_ref)))

    print("KERNEL_OK")
</pallas_src>

<mosaic_0001>
module attributes {stable_mosaic.version = 11 : i64} {
  func.func @mha_kernel(%arg0: i32, %arg1: i32, %arg2: memref<1x8x128xf32, #tpu.memory_space<vmem>>, %arg3: memref<1x8x64xf32, #tpu.memory_space<vmem>>, %arg4: memref<128x128xf32, #tpu.memory_space<vmem>>, %arg5: memref<1x128xf32, #tpu.memory_space<vmem>>, %arg6: memref<64x256xf32, #tpu.memory_space<vmem>>, %arg7: memref<1x256xf32, #tpu.memory_space<vmem>>, %arg8: memref<128x128xf32, #tpu.memory_space<vmem>>, %arg9: memref<1x128xf32, #tpu.memory_space<vmem>>, %arg10: memref<1x8x128xf32, #tpu.memory_space<vmem>>, %arg11: memref<1x8x8x8xf32, #tpu.memory_space<vmem>>) attributes {dimension_semantics = [#tpu.dimension_semantics<parallel>, #tpu.dimension_semantics<parallel>], iteration_bounds = array<i64: 2, 1>, scalar_prefetch = 0 : i64, scratch_operands = 0 : i64, tpu.core_type = #tpu.core_type<tc>, window_params = [{transform_indices = @transform_0, window_bounds = array<i64: 1, 8, 128>}, {transform_indices = @transform_1, window_bounds = array<i64: 1, 8, 64>}, {pipeline_mode = #tpu.pipeline_mode<synchronous>, transform_indices = @transform_2, window_bounds = array<i64: 128, 128>}, {pipeline_mode = #tpu.pipeline_mode<synchronous>, transform_indices = @transform_3, window_bounds = array<i64: 1, 128>}, {pipeline_mode = #tpu.pipeline_mode<synchronous>, transform_indices = @transform_4, window_bounds = array<i64: 64, 256>}, {pipeline_mode = #tpu.pipeline_mode<synchronous>, transform_indices = @transform_5, window_bounds = array<i64: 1, 256>}, {pipeline_mode = #tpu.pipeline_mode<synchronous>, transform_indices = @transform_6, window_bounds = array<i64: 128, 128>}, {pipeline_mode = #tpu.pipeline_mode<synchronous>, transform_indices = @transform_7, window_bounds = array<i64: 1, 128>}, {transform_indices = @transform_8, window_bounds = array<i64: 1, 8, 128>}, {transform_indices = @transform_9, window_bounds = array<i64: 1, 8, 8, 8>}]} {
    %c0 = arith.constant 0 : index
    %c0_0 = arith.constant 0 : index
    %c0_1 = arith.constant 0 : index
    %0 = vector.load %arg2[%c0, %c0_0, %c0_1] : memref<1x8x128xf32, #tpu.memory_space<vmem>>, vector<1x8x128xf32>
    %1 = vector.shape_cast %0 : vector<1x8x128xf32> to vector<8x128xf32>
    %c0_2 = arith.constant 0 : index
    %c0_3 = arith.constant 0 : index
    %c0_4 = arith.constant 0 : index
    %2 = vector.load %arg3[%c0_2, %c0_3, %c0_4] : memref<1x8x64xf32, #tpu.memory_space<vmem>>, vector<1x8x64xf32>
    %3 = vector.shape_cast %2 : vector<1x8x64xf32> to vector<8x64xf32>
    %4 = arith.truncf %1 : vector<8x128xf32> to vector<8x128xbf16>
    %c0_5 = arith.constant 0 : index
    %c0_6 = arith.constant 0 : index
    %5 = vector.load %arg4[%c0_5, %c0_6] : memref<128x128xf32, #tpu.memory_space<vmem>>, vector<128x128xf32>
    %6 = arith.truncf %5 : vector<128x128xf32> to vector<128x128xbf16>
    %cst = arith.constant dense<0.000000e+00> : vector<8x128xf32>
    %7 = tpu.matmul %4, %6, %cst {dimension_numbers = #tpu.dot_dimension_numbers<[1], [0], [0], [1], [0, 0, 1, 1], [], []>} : vector<8x128xbf16>, vector<128x128xbf16>, vector<8x128xf32> -> vector<8x128xf32>
    %c0_7 = arith.constant 0 : index
    %c0_8 = arith.constant 0 : index
    %8 = vector.load %arg5[%c0_7, %c0_8] : memref<1x128xf32, #tpu.memory_space<vmem>>, vector<1x128xf32>
    %9 = vector.broadcast %8 : vector<1x128xf32> to vector<8x128xf32>
    %10 = arith.addf %7, %9 : vector<8x128xf32>
    %11 = arith.truncf %3 : vector<8x64xf32> to vector<8x64xbf16>
    %c0_9 = arith.constant 0 : index
    %c0_10 = arith.constant 0 : index
    %12 = vector.load %arg6[%c0_9, %c0_10] : memref<64x256xf32, #tpu.memory_space<vmem>>, vector<64x256xf32>
    %13 = arith.truncf %12 : vector<64x256xf32> to vector<64x256xbf16>
    %cst_11 = arith.constant dense<0.000000e+00> : vector<8x256xf32>
    %14 = tpu.matmul %11, %13, %cst_11 {dimension_numbers = #tpu.dot_dimension_numbers<[1], [0], [0], [1], [0, 0, 1, 1], [], []>} : vector<8x64xbf16>, vector<64x256xbf16>, vector<8x256xf32> -> vector<8x256xf32>
    %c0_12 = arith.constant 0 : index
    %c0_13 = arith.constant 0 : index
    %15 = vector.load %arg7[%c0_12, %c0_13] : memref<1x256xf32, #tpu.memory_space<vmem>>, vector<1x256xf32>
    %16 = vector.broadcast %15 : vector<1x256xf32> to vector<8x256xf32>
    %17 = arith.addf %14, %16 : vector<8x256xf32>
    %18 = vector.shape_cast %10 : vector<8x128xf32> to vector<8x8x16xf32>
    %19 = tpu.transpose %18, [1, 0, 2] : vector<8x8x16xf32> -> vector<8x8x16xf32>
    %20 = vector.extract_strided_slice %17 {offsets = [0, 0], sizes = [8, 128], strides = [1, 1]} : vector<8x256xf32> to vector<8x128xf32>
    %21 = vector.shape_cast %20 : vector<8x128xf32> to vector<8x8x16xf32>
    %22 = tpu.transpose %21, [1, 0, 2] : vector<8x8x16xf32> -> vector<8x8x16xf32>
    %23 = vector.extract_strided_slice %17 {offsets = [0, 128], sizes = [8, 128], strides = [1, 1]} : vector<8x256xf32> to vector<8x128xf32>
    %24 = vector.shape_cast %23 : vector<8x128xf32> to vector<8x8x16xf32>
    %25 = tpu.transpose %24, [1, 0, 2] : vector<8x8x16xf32> -> vector<8x8x16xf32>
    %26 = arith.truncf %19 : vector<8x8x16xf32> to vector<8x8x16xbf16>
    %27 = arith.truncf %22 : vector<8x8x16xf32> to vector<8x8x16xbf16>
    "tpu.trace_start"() <{level = 10 : i32, message = "hne,hme->hnm"}> : () -> ()
    %cst_14 = arith.constant dense<0.000000e+00> : vector<8x8x8xf32>
    %28 = tpu.matmul %26, %27, %cst_14 {dimension_numbers = #tpu.dot_dimension_numbers<[2], [2], [1], [1], [0, 0, 0, 1, 1, 1], [0], [0]>} : vector<8x8x16xbf16>, vector<8x8x16xbf16>, vector<8x8x8xf32> -> vector<8x8x8xf32>
    "tpu.trace_stop"() : () -> ()
    %cst_15 = arith.constant dense<0xFF800000> : vector<8x8xf32>
    %29 = vector.multi_reduction <maximumf>, %28, %cst_15 [2] : vector<8x8x8xf32> to vector<8x8xf32>
    %30 = vector.shape_cast %29 : vector<8x8xf32> to vector<8x8x1xf32>
    %31 = vector.broadcast %30 : vector<8x8x1xf32> to vector<8x8x8xf32>
    %32 = arith.subf %28, %31 : vector<8x8x8xf32>
    %33 = math.exp %32 : vector<8x8x8xf32>
    %cst_16 = arith.constant dense<0.000000e+00> : vector<8x8xf32>
    %34 = vector.multi_reduction <add>, %33, %cst_16 [2] : vector<8x8x8xf32> to vector<8x8xf32>
    %35 = vector.shape_cast %34 : vector<8x8xf32> to vector<8x8x1xf32>
    %36 = vector.broadcast %35 : vector<8x8x1xf32> to vector<8x8x8xf32>
    %37 = arith.divf %33, %36 : vector<8x8x8xf32>
    %38 = arith.truncf %37 : vector<8x8x8xf32> to vector<8x8x8xbf16>
    %39 = arith.truncf %25 : vector<8x8x16xf32> to vector<8x8x16xbf16>
    "tpu.trace_start"() <{level = 10 : i32, message = "hnm,hme->hne"}> : () -> ()
    %cst_17 = arith.constant dense<0.000000e+00> : vector<8x8x16xf32>
    %40 = tpu.matmul %38, %39, %cst_17 {dimension_numbers = #tpu.dot_dimension_numbers<[2], [1], [1], [2], [0, 0, 0, 1, 1, 2], [0], [0]>} : vector<8x8x8xbf16>, vector<8x8x16xbf16>, vector<8x8x16xf32> -> vector<8x8x16xf32>
    "tpu.trace_stop"() : () -> ()
    %41 = tpu.transpose %40, [1, 0, 2] : vector<8x8x16xf32> -> vector<8x8x16xf32>
    %42 = vector.shape_cast %41 : vector<8x8x16xf32> to vector<8x128xf32>
    %43 = arith.truncf %42 : vector<8x128xf32> to vector<8x128xbf16>
    %c0_18 = arith.constant 0 : index
    %c0_19 = arith.constant 0 : index
    %44 = vector.load %arg8[%c0_18, %c0_19] : memref<128x128xf32, #tpu.memory_space<vmem>>, vector<128x128xf32>
    %45 = arith.truncf %44 : vector<128x128xf32> to vector<128x128xbf16>
    %cst_20 = arith.constant dense<0.000000e+00> : vector<8x128xf32>
    %46 = tpu.matmul %43, %45, %cst_20 {dimension_numbers = #tpu.dot_dimension_numbers<[1], [0], [0], [1], [0, 0, 1, 1], [], []>} : vector<8x128xbf16>, vector<128x128xbf16>, vector<8x128xf32> -> vector<8x128xf32>
    %c0_21 = arith.constant 0 : index
    %c0_22 = arith.constant 0 : index
    %47 = vector.load %arg9[%c0_21, %c0_22] : memref<1x128xf32, #tpu.memory_space<vmem>>, vector<1x128xf32>
    %48 = vector.broadcast %47 : vector<1x128xf32> to vector<8x128xf32>
    %49 = arith.addf %46, %48 : vector<8x128xf32>
    %c0_23 = arith.constant 0 : index
    %c0_24 = arith.constant 0 : index
    %c0_25 = arith.constant 0 : index
    %50 = vector.load %arg10[%c0_23, %c0_24, %c0_25] : memref<1x8x128xf32, #tpu.memory_space<vmem>>, vector<1x8x128xf32>
    %51 = vector.shape_cast %50 : vector<1x8x128xf32> to vector<8x128xf32>
    %52 = vector.shape_cast %49 : vector<8x128xf32> to vector<1x8x128xf32>
    tpu.vector_store %arg10[%c0_23, %c0_24, %c0_25], %52 {strides = array<i32>} : memref<1x8x128xf32, #tpu.memory_space<vmem>>, vector<1x8x128xf32>,
    %c0_26 = arith.constant 0 : index
    %c0_27 = arith.constant 0 : index
    %c0_28 = arith.constant 0 : index
    %c0_29 = arith.constant 0 : index
    %53 = vector.load %arg11[%c0_26, %c0_27, %c0_28, %c0_29] : memref<1x8x8x8xf32, #tpu.memory_space<vmem>>, vector<1x8x8x8xf32>
    %54 = vector.shape_cast %53 : vector<1x8x8x8xf32> to vector<8x8x8xf32>
    %55 = vector.shape_cast %37 : vector<8x8x8xf32> to vector<1x8x8x8xf32>
    tpu.vector_store %arg11[%c0_26, %c0_27, %c0_28, %c0_29], %55 {strides = array<i32>} : memref<1x8x8x8xf32, #tpu.memory_space<vmem>>, vector<1x8x8x8xf32>,
    return
  }
  func.func @transform_0(%arg0: i32, %arg1: i32) -> (i32, i32, i32) {
    %c0_i32 = arith.constant 0 : i32
    %c0_i32_0 = arith.constant 0 : i32
    return %arg0, %arg1, %c0_i32 : i32, i32, i32
  }
  func.func @transform_1(%arg0: i32, %arg1: i32) -> (i32, i32, i32) {
    %c0_i32 = arith.constant 0 : i32
    %c0_i32_0 = arith.constant 0 : i32
    %c0_i32_1 = arith.constant 0 : i32
    return %arg0, %c0_i32, %c0_i32_0 : i32, i32, i32
  }
  func.func @transform_2(%arg0: i32, %arg1: i32) -> (i32, i32) {
    %c0_i32 = arith.constant 0 : i32
    %c0_i32_0 = arith.constant 0 : i32
    %c0_i32_1 = arith.constant 0 : i32
    return %c0_i32, %c0_i32_0 : i32, i32
  }
  func.func @transform_3(%arg0: i32, %arg1: i32) -> (i32, i32) {
    %c0_i32 = arith.constant 0 : i32
    %c0_i32_0 = arith.constant 0 : i32
    %c0_i32_1 = arith.constant 0 : i32
    return %c0_i32, %c0_i32_0 : i32, i32
  }
  func.func @transform_4(%arg0: i32, %arg1: i32) -> (i32, i32) {
    %c0_i32 = arith.constant 0 : i32
    %c0_i32_0 = arith.constant 0 : i32
    %c0_i32_1 = arith.constant 0 : i32
    return %c0_i32, %c0_i32_0 : i32, i32
  }
  func.func @transform_5(%arg0: i32, %arg1: i32) -> (i32, i32) {
    %c0_i32 = arith.constant 0 : i32
    %c0_i32_0 = arith.constant 0 : i32
    %c0_i32_1 = arith.constant 0 : i32
    return %c0_i32, %c0_i32_0 : i32, i32
  }
  func.func @transform_6(%arg0: i32, %arg1: i32) -> (i32, i32) {
    %c0_i32 = arith.constant 0 : i32
    %c0_i32_0 = arith.constant 0 : i32
    %c0_i32_1 = arith.constant 0 : i32
    return %c0_i32, %c0_i32_0 : i32, i32
  }
  func.func @transform_7(%arg0: i32, %arg1: i32) -> (i32, i32) {
    %c0_i32 = arith.constant 0 : i32
    %c0_i32_0 = arith.constant 0 : i32
    %c0_i32_1 = arith.constant 0 : i32
    return %c0_i32, %c0_i32_0 : i32, i32
  }
  func.func @transform_8(%arg0: i32, %arg1: i32) -> (i32, i32, i32) {
    %c0_i32 = arith.constant 0 : i32
    %c0_i32_0 = arith.constant 0 : i32
    return %arg0, %arg1, %c0_i32 : i32, i32, i32
  }
  func.func @transform_9(%arg0: i32, %arg1: i32) -> (i32, i32, i32, i32) {
    %c0_i32 = arith.constant 0 : i32
    %c0_i32_0 = arith.constant 0 : i32
    %c0_i32_1 = arith.constant 0 : i32
    return %arg0, %c0_i32, %arg1, %c0_i32_0 : i32, i32, i32, i32
  }
}

</mosaic_0001>

<bundles_post_ra>
// kernel: tpu_custom_call.1
= control target key start
LH: loop header
LB: loop body
LE: loop exit
PB: predicated region body
PF: predicated region fallthrough
CT: control target
= control target key end

     0   :  { %s4784_s0 = inlined_call_operand.hbm [shape: f32[2,8,128], index: 0, kind: input, shape index: {}]   ;;  %s4785_s1 = inlined_call_operand.hbm [shape: f32[2,8,64], index: 1, kind: input, shape index: {}]   ;;  %s4786_s2 = inlined_call_operand.hbm [shape: f32[128,128], index: 2, kind: input, shape index: {}]   ;;  %s4787_s3 = inlined_call_operand.hbm [shape: f32[1,128], index: 3, kind: input, shape index: {}]   ;;  %s4788_s4 = inlined_call_operand.hbm [shape: f32[64,256], index: 4, kind: input, shape index: {}]   ;;  %s4789_s5 = inlined_call_operand.hbm [shape: f32[1,256], index: 5, kind: input, shape index: {}]   ;;  %s4790_s6 = inlined_call_operand.hbm [shape: f32[128,128], index: 6, kind: input, shape index: {}]   ;;  %s4791_s7 = inlined_call_operand.hbm [shape: f32[1,128], index: 7, kind: input, shape index: {}]   ;;  %s4792_s8 = inlined_call_operand.hbm [shape: f32[2,8,128], index: 8, kind: output, shape index: {0}]   ;;  %s4793_s9 = inlined_call_operand.hbm [shape: f32[2,8,8,8], index: 9, kind: output, shape index: {1}]  }
   0x1   :  { %4803 = sst [smem:[#allocation28_spill]] %s4786_s2 }
   0x2   :  { %4804 = sst [smem:[#allocation29_spill]] %s4787_s3 }
   0x3   :  { %4805 = sst [smem:[#allocation30_spill]] %s4788_s4 }
   0x4   :  { %4806 = sst [smem:[#allocation31_spill]] %s4789_s5 }
   0x5   :  { %4807 = sst [smem:[#allocation32_spill]] %s4790_s6 }
   0x6   :  { %4808 = sst [smem:[#allocation33_spill]] %s4792_s8 }
   0x7   :  { %4809 = sst [smem:[#allocation34_spill]] %s4793_s9 }
   0x8   :  { %15 = vsyncpa [#allocation3], 0 }
   0x9   :  { %17 = vsyncpa [#allocation3 + $0x1], 0 }
   0xa   :  { %18 = vsyncpa [#allocation6], 0 }
   0xb   :  { %20 = vsyncpa [#allocation6 + $0x1], 0 }
   0xc   :  { %21 = vsyncpa [#allocation9], 0 }
   0xd   :  { %22 = vsyncpa [#allocation12], 0 }
   0xe   :  { %23 = vsyncpa [#allocation15], 0 }
   0xf   :  { %24 = vsyncpa [#allocation4], 0 }
  0x10   :  { %26 = vsyncpa [#allocation4 + $0x1], 0 }
  0x11   :  { %27 = vsyncpa [#allocation18], 0 }
  0x12   :  { %29 = vsyncpa [#allocation18 + $0x1], 0  ;;  %s3913_s30 = smov 0   ;;  %s3915_s10 = smov 0  }
  0x13   :  { %s3917_s11 = smov 0   ;;  %s3919_s12 = smov 0  }
  0x14   :  { %s3921_s13 = smov 0   ;;  %s3923_s14 = smov 0  }
  0x15 LB: > { %4810 = sst [smem:[#allocation27_spill]] %s3825_s12  ;;  %s3944_s15 = sadd.s32 4294967295, %s3833_s14   ;;  %s3833_s14 = sphi %s3923_s14, %s35_s14   ;;  %s3829_s13 = sphi %s3921_s13, %s4848_s13   ;;  %s3825_s12 = sphi %s3919_s12, %s4847_s12   ;;  %s3821_s11 = sphi %s3917_s11, %s4846_s11   ;;  %s3817_s10 = sphi %s3915_s10, %s4845_s10   ;;  %s3813_s30 = sphi %s3913_s30, %s4844_s30  }
  0x16   : > { %p3020_p0 = scmp.ge.s32.totalorder %s3833_s14, 1  ;;  %p4797_p1 = scmp.eq.s32.totalorder %s3944_s15, 0 }
  0x17   : > { %p288_p2 = scmp.lt.s32.totalorder %s3833_s14, 3  ;;  %s3835_s17 = smov [#allocation7]  }
  0x18   : > { %s300_s18 = sshll.u32 %s3835_s17, 4  ;;  %s3836_s20 = smov [#allocation8]   ;;  %s3953_s18 = int_to_ptr.vmem [resolvable:$true] %s300_s18 }
  0x19   : > { %p3949_p3 = pnand %p3020_p0, %p288_p2  ;;  %s314_s21 = sshll.u32 %s3836_s20, 4  ;;  %s3964_s21 = int_to_ptr.vmem [resolvable:$true] %s314_s21 }
  0x1a   : > { %s3837_s22 = smov [#allocation11]   ;;  %s4813_s2 = sld [smem:[#allocation28_spill]] }
  0x1b   : > { %s4811_s16 = scalar_select %p3949_p3, 1, 0 }
  0x1c   : > { %p3320_p4 = pneg %p3949_p3  ;;  %s3966_s23 = sshll.u32 %s3837_s22, 4  ;;  %s339_s23 = int_to_ptr.vmem [resolvable:$true] %s3966_s23 }
  0x1e   : > { %p3960_p6 = pnand %p3320_p4, %p4797_p1 }
  0x20   : > { %s3471_s26 = scalar_lea.hbm %s4813_s2, 2048  ;;  %p3976_p8 = pneg %p3960_p6 }
  0x21   : > { %p3472_p7 = scmp.ne.s32.totalorder %s4813_s2, %s3471_s26  ;;  %p3478_p11 = scmp.lt.u32.totalorder %s3471_s26, %s4813_s2 }
  0x23   : > { %p3474_p9 = pnand %p3976_p8, %p3472_p7 }
  0x25   : > { %p3475_p10 = pneg %p3474_p9 }
  0x27   : > { %p3480_p12 = pnand %p3478_p11, %p3475_p10 }
  0x29   : > { %3483 = shalt.err (!%p3480_p12)
}
  0x2a   : > { %s3484_s22 = scalar_lea.vmem %s3953_s18, 2048  ;;  %p3492_p4 = scmp.lt.s32.totalorder %s3953_s18, %s3953_s18 }
  0x2b   : > { %p3485_p13 = scmp.ne.s32.totalorder %s3953_s18, %s3484_s22  ;;  %p3493_p5 = scmp.lt.s32.totalorder %s3484_s22, %s3484_s22 }
  0x2d   : > { %p3487_p0 = pnand %p3485_p13, %p3976_p8  ;;  %p3494_p7 = por %p3493_p5, %p3492_p4 }
  0x2f   : > { %p3488_p2 = pneg %p3487_p0 }
  0x31   : > { %p3495_p9 = pnand %p3494_p7, %p3488_p2 }
  0x33   : > { %3498 = shalt.err (!%p3495_p9)
}
  0x34   : > { %s4799_s24 = smov 128   ;;  %s4800_s25 = smov 8  }
  0x35   : > { %3323 = dma.hbm_to_vmem [thread:$0]  (!%p3960_p6), %s4813_s2, 2048, %s3953_s18, [#allocation6], %s4799_s24, %s4799_s24, %s4800_s25  }
  0x36   : > { %s4815_s3 = sld [smem:[#allocation29_spill]] }
  0x3c   : > { %s3499_s20 = scalar_lea.hbm %s4815_s3, 16 }
  0x3d   : > { %p3500_p5 = scmp.ne.s32.totalorder %s4815_s3, %s3499_s20  ;;  %p3506_p12 = scmp.lt.u32.totalorder %s3499_s20, %s4815_s3 }
  0x3f   : > { %p3502_p10 = pnand %p3500_p5, %p3976_p8 }
  0x41   : > { %p3503_p11 = pneg %p3502_p10 }
  0x43   : > { %p3508_p13 = pnand %p3506_p12, %p3503_p11 }
  0x45   : > { %3511 = shalt.err (!%p3508_p13)
}
  0x46   : > { %s3512_s18 = scalar_lea.vmem %s3964_s21, 16  ;;  %s3519_s8 = scalar_lea.vmem %s3964_s21, 32 }
  0x47   : > { %p3513_p0 = scmp.ne.s32.totalorder %s3964_s21, %s3512_s18  ;;  %p3520_p7 = scmp.lt.s32.totalorder %s3964_s21, %s3964_s21 }
  0x48   : > { %p3521_p9 = scmp.lt.s32.totalorder %s3519_s8, %s3512_s18 }
  0x49   : > { %p3515_p2 = pnand %p3513_p0, %p3976_p8 }
  0x4a   : > { %p3522_p5 = por %p3521_p9, %p3520_p7 }
  0x4b   : > { %p3516_p4 = pneg %p3515_p2 }
  0x4d   : > { %p3523_p10 = pnand %p3522_p5, %p3516_p4 }
  0x4f   : > { %3526 = shalt.err (!%p3523_p10)
}
  0x50   : > { %3326 = dma.hbm_to_vmem [thread:$0]  (!%p3960_p6), %s4815_s3, 16, %s3964_s21, [#allocation9]  }
  0x51   : > { %s4816_s5 = sld [smem:[#allocation31_spill]] }
  0x57   : > { %s3527_s28 = scalar_lea.hbm %s4816_s5, 32 }
  0x58   : > { %p3528_p11 = scmp.ne.s32.totalorder %s4816_s5, %s3527_s28  ;;  %p3534_p0 = scmp.lt.u32.totalorder %s3527_s28, %s4816_s5 }
  0x5a   : > { %p3530_p12 = pnand %p3528_p11, %p3976_p8 }
  0x5c   : > { %p3531_p13 = pneg %p3530_p12 }
  0x5e   : > { %p3536_p2 = pnand %p3534_p0, %p3531_p13 }
  0x60   : > { %3539 = shalt.err (!%p3536_p2)
}
  0x61   : > { %s3540_s8 = scalar_lea.vmem %s339_s23, 32  ;;  %p3548_p5 = scmp.lt.s32.totalorder %s339_s23, %s339_s23 }
  0x62   : > { %p3541_p4 = scmp.ne.s32.totalorder %s339_s23, %s3540_s8  ;;  %p3549_p10 = scmp.lt.s32.totalorder %s3540_s8, %s3540_s8 }
  0x64   : > { %p3543_p7 = pnand %p3541_p4, %p3976_p8  ;;  %p3550_p1 = por %p3549_p10, %p3548_p5 }
  0x66   : > { %p3544_p9 = pneg %p3543_p7 }
  0x68   : > { %p3551_p3 = pnand %p3550_p1, %p3544_p9 }
  0x6a   : > { %3554 = shalt.err (!%p3551_p3)
}
  0x6b   : > { %3332 = dma.hbm_to_vmem [thread:$0]  (!%p3960_p6), %s4816_s5, 32, %s339_s23, [#allocation12]  }
  0x6c   : > { %s3840_s12 = smov [#allocation10]   ;;  %s4817_s4 = sld [smem:[#allocation30_spill]] }
  0x6d   : > { %s324_s26 = sshll.u32 %s3840_s12, 4  ;;  %s325_s26 = int_to_ptr.vmem [resolvable:$true] %s324_s26 }
  0x72   : > { %s3555_s17 = scalar_lea.hbm %s4817_s4, 2048 }
  0x73   : > { %p3556_p11 = scmp.ne.s32.totalorder %s4817_s4, %s3555_s17  ;;  %p3562_p12 = scmp.lt.u32.totalorder %s3555_s17, %s4817_s4 }
  0x75   : > { %p3558_p1 = pnand %p3556_p11, %p3976_p8 }
  0x77   : > { %p3559_p3 = pneg %p3558_p1 }
  0x79   : > { %p3564_p13 = pnand %p3562_p12, %p3559_p3 }
  0x7b   : > { %3567 = shalt.err (!%p3564_p13)
}
  0x7c   : > { %s3568_s23 = scalar_lea.vmem %s325_s26, 2048  ;;  %p3576_p7 = scmp.lt.s32.totalorder %s325_s26, %s325_s26 }
  0x7d   : > { %p3569_p0 = scmp.ne.s32.totalorder %s325_s26, %s3568_s23  ;;  %p3577_p9 = scmp.lt.s32.totalorder %s3568_s23, %s3568_s23 }
  0x7f   : > { %p3571_p2 = pnand %p3569_p0, %p3976_p8  ;;  %p3578_p5 = por %p3577_p9, %p3576_p7 }
  0x81   : > { %p3572_p4 = pneg %p3571_p2 }
  0x83   : > { %p3579_p10 = pnand %p3578_p5, %p3572_p4 }
  0x85   : > { %3582 = shalt.err (!%p3579_p10)
}
  0x86   : > { %s3841_s21 = smov 256   ;;  %s3842_s9 = smov 16  }
  0x87   : > { %3329 = dma.hbm_to_vmem [thread:$0]  (!%p3960_p6), %s4817_s4, 2048, %s325_s26, [#allocation9], %s3841_s21, %s3841_s21, %s3842_s9  }
  0x88   : > { %s3843_s28 = smov [#allocation13]   ;;  %s3844_s20 = smov [#allocation14]  }
  0x89   : > { %s348_s17 = sshll.u32 %s3843_s28, 4  ;;  %s362_s22 = sshll.u32 %s3844_s20, 4  ;;  %s349_s17 = int_to_ptr.vmem [resolvable:$true] %s348_s17  ;;  %s4061_s22 = int_to_ptr.vmem [resolvable:$true] %s362_s22 }
  0x8a   : > { %s4818_s6 = sld [smem:[#allocation32_spill]] }
  0x90   : > { %s3583_s23 = scalar_lea.hbm %s4818_s6, 2048 }
  0x91   : > { %p3584_p11 = scmp.ne.s32.totalorder %s4818_s6, %s3583_s23  ;;  %p3590_p12 = scmp.lt.u32.totalorder %s3583_s23, %s4818_s6 }
  0x93   : > { %p3586_p1 = pnand %p3584_p11, %p3976_p8 }
  0x95   : > { %p3587_p3 = pneg %p3586_p1 }
  0x97   : > { %p3592_p13 = pnand %p3590_p12, %p3587_p3 }
  0x99   : > { %3595 = shalt.err (!%p3592_p13)
}
  0x9a   : > { %s3596_s21 = scalar_lea.vmem %s349_s17, 2048  ;;  %p3604_p7 = scmp.lt.s32.totalorder %s349_s17, %s349_s17 }
  0x9b   : > { %p3597_p0 = scmp.ne.s32.totalorder %s349_s17, %s3596_s21  ;;  %p3605_p9 = scmp.lt.s32.totalorder %s3596_s21, %s3596_s21 }
  0x9d   : > { %p3599_p2 = pnand %p3597_p0, %p3976_p8  ;;  %p3606_p5 = por %p3605_p9, %p3604_p7 }
  0x9f   : > { %p3600_p4 = pneg %p3599_p2 }
  0xa1   : > { %p3607_p10 = pnand %p3606_p5, %p3600_p4 }
  0xa3   : > { %3610 = shalt.err (!%p3607_p10)
}
  0xa4   : > { %s4819_s24 = smov 8   ;;  %s4820_s25 = smov 128  }
  0xa5   : > { %3335 = dma.hbm_to_vmem [thread:$0]  (!%p3960_p6), %s4818_s6, 2048, %s349_s17, [#allocation12], %s4820_s25, %s4820_s25, %s4819_s24  }
  0xa6   : > { %s3611_s18 = scalar_lea.hbm %s4791_s7, 16 }
  0xa7   : > { %p3612_p11 = scmp.ne.s32.totalorder %s4791_s7, %s3611_s18  ;;  %p3618_p12 = scmp.lt.u32.totalorder %s3611_s18, %s4791_s7 }
  0xa9   : > { %p3614_p1 = pnand %p3612_p11, %p3976_p8 }
  0xab   : > { %p3615_p3 = pneg %p3614_p1 }
  0xad   : > { %p3620_p13 = pnand %p3618_p12, %p3615_p3 }
  0xaf   : > { %3623 = shalt.err (!%p3620_p13)
}
  0xb0   : > { %s3624_s17 = scalar_lea.vmem %s4061_s22, 16  ;;  %s3631_s21 = scalar_lea.vmem %s4061_s22, 32 }
  0xb1   : > { %p3625_p0 = scmp.ne.s32.totalorder %s4061_s22, %s3624_s17  ;;  %p3632_p7 = scmp.lt.s32.totalorder %s4061_s22, %s4061_s22 }
  0xb2   : > { %p3633_p9 = scmp.lt.s32.totalorder %s3631_s21, %s3624_s17 }
  0xb3   : > { %p3627_p2 = pnand %p3625_p0, %p3976_p8 }
  0xb4   : > { %p3634_p5 = por %p3633_p9, %p3632_p7 }
  0xb5   : > { %p3628_p4 = pneg %p3627_p2 }
  0xb7   : > { %p3635_p10 = pnand %p3634_p5, %p3628_p4 }
  0xb9   : > { %3638 = shalt.err (!%p3635_p10)
}
  0xba   : > { %3338 = dma.hbm_to_vmem [thread:$0]  (!%p3960_p6), %s4791_s7, 16, %s4061_s22, [#allocation15]  }
  0xbb   : > { %s3019_s29 = sadd.s32 4294967294, %s3833_s14   ;;  %s47_s9 = sadd.s32 1, %s3829_s13 }
  0xbc   : > { %p49_p8 = scmp.ge.s32.totalorder %s47_s9, 2  ;;  %s56_s19 = sadd.s32 1, %s3821_s11 }
  0xbd   : > { %p63_p11 = scmp.ne.s32.totalorder %s3821_s11, %s3817_s10  ;;  %p64_p1 = scmp.eq.s32.totalorder %s3833_s14, 0 }
  0xbe   : > { %s4850_s9 = smov (%p49_p8, %s47_s9), 0  ;;  %p69_p12 = scmp.ne.s32.totalorder %s3817_s10, %s3813_s30 }
  0xbf   : > { %p4116_p3 = por %p64_p1, %p63_p11  ;;  %s51_s22 = ssub.s32 %s3829_s13, %s4850_s9 }
  0xc0   : > { %p247_p6 = scmp.eq.s32.totalorder %s3944_s15, 1  ;;  %p54_p13 = scmp.eq.s32.totalorder %s51_s22, 0 }
  0xc1   : > { %p4822_p0 = scmp.eq.s32.totalorder %s3944_s15, 0  ;;  %p253_p7 = scmp.eq.s32.totalorder %s3019_s29, 1 }
  0xc2   : > { %p4131_p4 = por %p247_p6, %p63_p11  ;;  %p3359_p5 = scmp.lt.s32.totalorder %s3833_s14, 2 }
  0xc3   : > { %p4127_p2 = por %p4822_p0, %p69_p12  ;;  %p4138_p9 = por %p253_p7, %p69_p12 }
  0xc4   : > { %s4824_s20 = scalar_select %p4131_p4, 1, 0 }
  0xc5   : > { %s4823_s28 = scalar_select %p4127_p2, 1, 0 }
  0xc6   : > { %s4136_s18 = scalar_select %p54_p13, %s3821_s11, %s56_s19  }
  0xc7   : > { %s4825_s8 = scalar_select %p4138_p9, 1, 0 }
  0xc8   : > { %s373_s23 = sand.u32 1, %s3821_s11   ;;  %s3029_s12 = sshll.u32 %s3829_s13, 7 }
  0xc9   : > { %s4145_s26 = sshll.u32 %s373_s23, 3  ;;  %s4150_s24 = scalar_lea.hbm %s4784_s0, %s3029_s12 }
  0xca   : > { %s377_s25 = scalar_lea.vmem [#allocation2], %s4145_s26  ;;  %p4155_p10 = pnand %p3359_p5, %p4116_p3 }
  0xcb   : > { %s385_s29 = sshll.u32 %s377_s25, 4  ;;  %s4164_s21 = scalar_lea.hbm %s4785_s1, %s3029_s12  ;;  %s4159_s29 = int_to_ptr.vmem [resolvable:$true] %s385_s29 }
  0xcc   : > { %s374_s2 = scalar_lea.sflag [#allocation3], %s373_s23  ;;  %s3639_s3 = scalar_lea.hbm %s4150_s24, 128 }
  0xcd   : > { %p3640_p8 = scmp.ne.s32.totalorder %s4150_s24, %s3639_s3  ;;  %p3641_p11 = pneg %p4155_p10 }
  0xce   : > { %s3644_s4 = scalar_lea.hbm %s4784_s0, 256  ;;  %p3645_p12 = scmp.lt.u32.totalorder %s4150_s24, %s4784_s0 }
  0xcf   : > { %p3642_p1 = pnand %p3641_p11, %p3640_p8  ;;  %p3646_p6 = scmp.lt.u32.totalorder %s3644_s4, %s3639_s3 }
  0xd0   : > { %p3648_p0 = scmp.lt.u32.totalorder %s3639_s3, %s4150_s24 }
  0xd1   : > { %p3643_p3 = pneg %p3642_p1  ;;  %p3647_p13 = por %p3646_p6, %p3645_p12 }
  0xd3   : > { %p3649_p7 = por %p3648_p0, %p3647_p13 }
  0xd5   : > { %p3650_p5 = pnand %p3649_p7, %p3643_p3 }
  0xd7   : > { %3653 = shalt.err (!%p3650_p5)
}
  0xd8   : > { %s3654_s23 = scalar_lea.vmem %s4159_s29, 128  ;;  %s3845_s12 = smov [#allocation2]  }
  0xd9   : > { %p3655_p8 = scmp.ne.s32.totalorder %s4159_s29, %s3654_s23  ;;  %s3659_s22 = sshll.u32 %s3845_s12, 4  ;;  %s3660_s22 = int_to_ptr.vmem [resolvable:$false] %s3659_s22 }
  0xda   : > { %s3661_s5 = scalar_lea.vmem %s3660_s22, 256  ;;  %p3662_p4 = scmp.lt.s32.totalorder %s4159_s29, %s3660_s22 }
  0xdb   : > { %p3657_p1 = pnand %p3655_p8, %p3641_p11  ;;  %p3663_p12 = scmp.lt.s32.totalorder %s3661_s5, %s3654_s23 }
  0xdd   : > { %p3658_p9 = pneg %p3657_p1  ;;  %p3664_p6 = por %p3663_p12, %p3662_p4 }
  0xdf   : > { %p3665_p13 = pnand %p3664_p6, %p3658_p9 }
  0xe1   : > { %3668 = shalt.err (!%p3665_p13)
}
  0xe2   : > { %3342 = dma.hbm_to_vmem [thread:$0]  (!%p4155_p10), %s4150_s24, 128, %s4159_s29, %s374_s2  }
  0xe3   : > { %s392_s3 = sand.u32 1, %s3833_s14   ;;  %s396_s4 = scalar_lea.vmem [#allocation5], %s4145_s26 }
  0xe4   : > { %s403_s6 = sshll.u32 %s396_s4, 4  ;;  %s393_s17 = scalar_lea.sflag [#allocation6], %s392_s3  ;;  %s404_s6 = int_to_ptr.vmem [resolvable:$true] %s403_s6 }
  0xe5   : > { %s3669_s27 = scalar_lea.hbm %s4164_s21, 128  ;;  %s3674_s12 = scalar_lea.hbm %s4785_s1, 256 }
  0xe6   : > { %p3670_p4 = scmp.ne.s32.totalorder %s4164_s21, %s3669_s27  ;;  %p3675_p0 = scmp.lt.u32.totalorder %s4164_s21, %s4785_s1 }
  0xe7   : > { %p3676_p7 = scmp.lt.u32.totalorder %s3674_s12, %s3669_s27  ;;  %p3678_p8 = scmp.lt.u32.totalorder %s3669_s27, %s4164_s21 }
  0xe8   : > { %p3672_p9 = pnand %p3670_p4, %p3641_p11 }
  0xe9   : > { %p3677_p5 = por %p3676_p7, %p3675_p0 }
  0xea   : > { %p3673_p3 = pneg %p3672_p9 }
  0xeb   : > { %p3679_p1 = por %p3678_p8, %p3677_p5 }
  0xed   : > { %p3680_p12 = pnand %p3679_p1, %p3673_p3 }
  0xef   : > { %3683 = shalt.err (!%p3680_p12)
}
  0xf0   : > { %s3684_s2 = scalar_lea.vmem %s404_s6, 128  ;;  %s3846_s26 = smov [#allocation5]  }
  0xf1   : > { %p3685_p6 = scmp.ne.s32.totalorder %s404_s6, %s3684_s2  ;;  %s3689_s24 = sshll.u32 %s3846_s26, 4  ;;  %s3690_s24 = int_to_ptr.vmem [resolvable:$false] %s3689_s24 }
  0xf2   : > { %s3691_s29 = scalar_lea.vmem %s3690_s24, 256  ;;  %p3692_p9 = scmp.lt.s32.totalorder %s404_s6, %s3690_s24 }
  0xf3   : > { %p3687_p13 = pnand %p3685_p6, %p3641_p11  ;;  %p3693_p2 = scmp.lt.s32.totalorder %s3691_s29, %s3684_s2 }
  0xf5   : > { %p3688_p4 = pneg %p3687_p13  ;;  %p3694_p0 = por %p3693_p2, %p3692_p9 }
  0xf7   : > { %p3695_p7 = pnand %p3694_p0, %p3688_p4 }
  0xf9   : > { %3698 = shalt.err (!%p3695_p7)
}
  0xfa   : > { %3345 = dma.hbm_to_vmem [thread:$0]  (!%p4155_p10), %s4164_s21, 128, %s404_s6, %s393_s17  }
  0xfb   : > { %p4827_p3 = scmp.ne.s32.totalorder %s4811_s16, 0 }
  0xfc   : > { %s4215_s3 = sand.u32 (!%p4827_p3), 1, %s3817_s10   ;;  %p4828_p2 = scmp.ne.s32.totalorder (!%p4827_p3), %s4823_s28, 0 }
  0xfd   : > { %412 = sbr.rel (%p4827_p3) target bundleno = 1868 (0x74c), region = 52  ;;  %s4218_s4 = sshll.u32 (!%p4827_p3), %s4215_s3, 3 }
  0xfe   : > { %s415_s27 = scalar_lea.sflag (!%p4827_p3), [#allocation3], %s4215_s3  ;;  %s418_s25 = scalar_lea.vmem (!%p4827_p3), [#allocation2], %s4218_s4 }
 0x104   : > { %3780 = dma.done.wait (%p4828_p2), %s415_s27, 128  }
 0x105   : > { %3782 = vsyncadd (%p4828_p2), %s415_s27, 4294967168  ;;  %s423_s16 = sand.u32 1, %s3944_s15   ;;  %s427_s21 = scalar_lea.vmem [#allocation5], %s4218_s4 }
 0x106   : > { %s424_s19 = scalar_lea.sflag [#allocation6], %s423_s16 }
 0x107   : > { %3784 = dma.done.wait (%p4828_p2), %s424_s19, 128  }
 0x108   : > { %3786 = vsyncadd (%p4828_p2), %s424_s19, 4294967168  ;;  %p4829_p10 = scmp.eq.s32.totalorder %s3944_s15, 0 }
 0x10a   : > { %3788 = dma.done.wait (%p4829_p10), [#allocation6], 2048   ;;  %p4830_p11 = pmov %p4829_p10 }
 0x10b   : > { %p4831_p5 = pmov %p4829_p10 }
 0x10c   : > { %3790 = vsyncadd (%p4830_p11), [#allocation6], 4294965248 }
 0x10d   : > { %3792 = dma.done.wait (%p4831_p5), [#allocation9], 2064   ;;  %p4832_p8 = pmov %p4831_p5 }
 0x10e   : > { %p4833_p1 = pmov %p4831_p5 }
 0x10f   : > { %3794 = vsyncadd (%p4832_p8), [#allocation9], 4294965232 }
 0x110   : > { %3796 = dma.done.wait (%p4833_p1), [#allocation12], 2080   ;;  %p4834_p12 = pmov %p4833_p1 }
 0x111   : > { %p4835_p6 = pmov %p4833_p1 }
 0x112   : > { %3798 = vsyncadd (%p4834_p12), [#allocation12], 4294965216 }
 0x113   : > { %3800 = dma.done.wait (%p4835_p6), [#allocation15], 16   ;;  %p4836_p13 = pmov %p4833_p1 }
 0x114   : > { %v3847_v0 = vmov 0.0   ;;  %v3848_v1 = vmov 0   ;;  %vm3849_vm0 = vmmov 0   ;;  %v500_v2 = vld [vmem:[#allocation7] sm:$0xff]  ;;  %v501_v3 = vld [vmem:[#allocation7 + $0x8] sm:$0xff]  ;;  %v574_v8 = vld [vmem:[#allocation10 + $0x10] sm:$0xff]  ;;  %v598_v54 = vlaneseq }
 0x115   : > { %3802 = vsyncadd (%p4836_p13), [#allocation15], 4294967280  ;;  %3152 = vmatprep.subr.bf16.mxu0 %v3847_v0  ;;  %644 = vmatprep.mubr.bf16.mxu1 %v3848_v1  ;;  %v573_v4 = vld [vmem:[#allocation10 + $0x8] sm:$0xff]  ;;  %v516_v5 = vpack.c.bf16 %v501_v3, %v500_v2  ;;  %v575_v6 = vld [vmem:[#allocation10 + $0x18] sm:$0xff]  ;;  %vm608_vm1 = vcmask 523264   ;;  %s3850_s15 = smov 112  }
 0x116   : > { %3168 = vmatprep.mubr.msk.bf16.mxu0 %vm3849_vm0, %v3847_v0  ;;  %v572_v7 = vld [vmem:[#allocation10] sm:$0xff]  ;;  %v589_v9 = vpack.c.bf16 %v575_v6, %v573_v4  ;;  %v502_v11 = vld [vmem:[#allocation7 + $0x10] sm:$0xff]  ;;  %v503_v12 = vld [vmem:[#allocation7 + $0x18] sm:$0xff]  ;;  %v599_v55 = vshrl.u32 %v598_v54, 7  ;;  %s3851_s28 = smov 80   ;;  %s3852_s6 = smov 96  }
 0x117   : > { %v588_v10 = vpack.c.bf16 %v574_v8, %v572_v7  ;;  %v577_v13 = vld [vmem:[#allocation10 + $0x28] sm:$0xff]  ;;  %3153 = vmatpush3.bf16.msra.mxu0 %v516_v5  ;;  %v517_v14 = vpack.c.bf16 %v503_v12, %v502_v11  ;;  %v579_v15 = vld [vmem:[#allocation10 + $0x38] sm:$0xff]  ;;  %v576_v16 = vld [vmem:[#allocation10 + $0x20] sm:$0xff]  ;;  %s3853_s17 = smov 64   ;;  %s3854_s23 = smov 32   ;;  %vm1551_vm2 = vcmask 130048  }
 0x118   : > { %v578_v17 = vld [vmem:[#allocation10 + $0x30] sm:$0xff]  ;;  %612 = vmatprep.subr.bf16.mxu1 %v589_v9  ;;  %3154 = vmatprep.subr.bf16.mxu0 %v3847_v0  ;;  %v591_v18 = vpack.c.bf16 %v579_v15, %v577_v13  ;;  %v504_v19 = vld [vmem:[#allocation7 + $0x20] sm:$0xff]  ;;  %v505_v20 = vld [vmem:[#allocation7 + $0x28] sm:$0xff]  ;;  %v600_v56 = vsub.s32 0, %v599_v55  ;;  %s3855_s12 = smov 48   ;;  %v604_v7 = vsub.s32 1, %v599_v55 }
 0x119   : > { %v581_v21 = vld [vmem:[#allocation10 + $0x48] sm:$0xff]  ;;  %613 = vmatpush1.bf16.msra.mxu1 %v588_v10  ;;  %v590_v22 = vpack.c.bf16 %v578_v17, %v576_v16  ;;  %v583_v23 = vld [vmem:[#allocation10 + $0x58] sm:$0xff]  ;;  %v580_v25 = vld [vmem:[#allocation10 + $0x40] sm:$0xff]  ;;  %v518_v27 = vpack.c.bf16 %v505_v20, %v504_v19  ;;  %s3856_s22 = smov 16   ;;  %v3857_v10 = vmov 1983009808  }
 0x11a   : > { %614 = vmatprep.subr.bf16.mxu1 %v591_v18  ;;  %v593_v24 = vpack.c.bf16 %v583_v23, %v581_v21  ;;  %v582_v26 = vld [vmem:[#allocation10 + $0x50] sm:$0xff]  ;;  %v585_v28 = vld [vmem:[#allocation10 + $0x68] sm:$0xff]  ;;  %v587_v29 = vld [vmem:[#allocation10 + $0x78] sm:$0xff]  ;;  %v678_v11 = vunpack.c.l.s4 %v3857_v10  ;;  %v3858_v13 = vmov 1934713408   ;;  %vm2028_vm3 = vcmask 1043456  }
 0x11b   : > { %3155 = vmatpush3.bf16.msra.mxu0 %v517_v14  ;;  %v506_v30 = vld [vmem:[#allocation7 + $0x30] sm:$0xff]  ;;  %v507_v31 = vld [vmem:[#allocation7 + $0x38] sm:$0xff]  ;;  %v592_v32 = vpack.c.bf16 %v582_v26, %v580_v25  ;;  %v595_v33 = vpack.c.bf16 %v587_v29, %v585_v28  ;;  %v584_v34 = vld [vmem:[#allocation10 + $0x60] sm:$0xff]  ;;  %v742_v14 = vunpack.c.l.s4 %v3858_v13  ;;  %vm1920_vm4 = vcmask 64512   ;;  %s3042_s5 = sshll.u32 %s4215_s3, 6  ;;  %s4837_s26 = sld [smem:[#allocation27_spill]] }
 0x11c   : > { %3156 = vmatprep.subr.bf16.mxu0 %v3847_v0  ;;  %v586_v35 = vld [vmem:[#allocation10 + $0x70] sm:$0xff]  ;;  %v519_v36 = vpack.c.bf16 %v507_v31, %v506_v30  ;;  %v508_v37 = vld [vmem:[#allocation7 + $0x40] sm:$0xff]  ;;  %v509_v38 = vld [vmem:[#allocation7 + $0x48] sm:$0xff]  ;;  %v679_v12 = vunpack.c.0.s8 %v678_v11  ;;  %s4564_s2 = scalar_lea.vmem [#allocation17], %s3042_s5  ;;  %vm2695_vm5 = vcmask 261120   ;;  %vm2697_vm6 = vcmask 392192  }
 0x11d   : > { %615 = vmatpush1.bf16.msra.mxu1 %v590_v22  ;;  %v594_v39 = vpack.c.bf16 %v586_v35, %v584_v34  ;;  %v498_v40 = vld [vmem:[%s427_s21] sm:$0xff]  ;;  %v520_v41 = vpack.c.bf16 %v509_v38, %v508_v37  ;;  %v512_v46 = vld [vmem:[#allocation7 + $0x60] sm:$0xff]  ;;  %v513_v47 = vld [vmem:[#allocation7 + $0x68] sm:$0xff]  ;;  %v743_v20 = vunpack.c.0.s8 %v742_v14  ;;  %vm2700_vm7 = vcmask 654336   ;;  %s2821_s29 = sshll.u32 %s4564_s2, 4  ;;  %s4838_s16 = sld [smem:[#allocation34_spill]]  ;;  %s4704_s29 = int_to_ptr.vmem [resolvable:$true] %s2821_s29 }
 0x11e   : > { %616 = vmatprep.subr.bf16.mxu1 %v593_v24  ;;  %v571_v42 = vpack.c.bf16 %v498_v40, %v498_v40  ;;  %v510_v43 = vld [vmem:[#allocation7 + $0x50] sm:$0xff]  ;;  %v511_v44 = vld [vmem:[#allocation7 + $0x58] sm:$0xff]  ;;  %v522_v48 = vpack.c.bf16 %v513_v47, %v512_v46  ;;  %v497_v52 = vld [vmem:[%s418_s25] sm:$0xff]  ;;  %v4300_v17 = vsub.s32 %v679_v12, %v599_v55  ;;  %vm2702_vm8 = vcmask 785408   ;;  %s2793_s21 = scalar_lea.sflag [#allocation18], %s4215_s3  ;;  %p4839_p9 = scmp.ne.s32.totalorder %s4824_s20, 0 }
 0x11f   : > { %3157 = vmatpush3.bf16.msra.mxu0 %v518_v27  ;;  %v521_v45 = vpack.c.bf16 %v511_v44, %v510_v43  ;;  %v514_v49 = vld [vmem:[#allocation7 + $0x70] sm:$0xff]  ;;  %v515_v50 = vld [vmem:[#allocation7 + $0x78] sm:$0xff]  ;;  %v499_v53 = vpack.c.bf16 %v497_v52, %v497_v52  ;;  %v596_v57 = vld [vmem:[#allocation11] sm:$0x3]  ;;  %v4304_v26 = vsub.s32 %v743_v20, %v599_v55  ;;  %vm2704_vm9 = vcmask 916480  }
 0x120   : > { %3158 = vmatprep.subr.bf16.mxu0 %v3847_v0  ;;  %v523_v51 = vpack.c.bf16 %v515_v50, %v514_v49  ;;  %v601_v58 = vrot.slane %v596_v57, %v600_v56  ;;  %v3043_v1 = vld [vmem:[#allocation8] ss:$0 sm:$0xff]  ;;  %v605_v8 = vrot.slane %v596_v57, %v604_v7 }
 0x121   : > { %617 = vmatpush1.bf16.msra.mxu1 %v592_v32  ;;  %s3101_s24 = sshll.u32 %s4837_s26, 10 }
 0x122   : > { %618 = vmatprep.subr.bf16.mxu1 %v595_v33 }
 0x123   : > { %3159 = vmatpush3.bf16.msra.mxu0 %v519_v36  ;;  %s4702_s19 = scalar_lea.hbm %s4838_s16, %s3101_s24 }
 0x124   : > { %3160 = vmatprep.subr.bf16.mxu0 %v3847_v0 }
 0x125   : > { %619 = vmatpush1.bf16.msra.mxu1 %v594_v39 }
 0x126   : > { %3172 = vmatprep.subr.bf16.mxu1 %v3847_v0 }
 0x127   : > { %3161 = vmatpush3.bf16.msra.mxu0 %v520_v41 }
 0x128   : > { %3044 = vmatmul.mubr.msk.bf16.vlgmr.msra.gmra.mrb[0].mxu1 %vm608_vm1, %v571_v42  ;;  %3162 = vmatprep.subr.bf16.mxu0 %v3847_v0 }
 0x129   : > { %3174 = vmatprep.mubr.msk.bf16.mxu1 %vm3849_vm0, %v3847_v0 }
 0x12b   : > { %3163 = vmatpush3.bf16.msra.mxu0 %v521_v45 }
 0x12c   : > { %3164 = vmatprep.subr.bf16.mxu0 %v3847_v0 }
 0x12f   : > { %3165 = vmatpush3.bf16.msra.mxu0 %v522_v48 }
 0x130   : > { %3166 = vmatprep.subr.bf16.mxu0 %v3847_v0 }
 0x133   : > { %3167 = vmatpush3.bf16.msra.mxu0 %v523_v51 }
 0x134   : > { %3208 = vmatprep.subr.bf16.mxu0 %v3847_v0 }
 0x136   : > { %3169 = vmatmul.mubr.bf16.vlgmr.msra.gmra.mrb[0].mxu0 %v499_v53 }
 0x137   : > { %3210 = vmatprep.mubr.msk.bf16.mxu0 %vm3849_vm0, %v3847_v0 }
 0x1fb   : > { %v646_v59 = vpop.f32.mrb[0].mxu1 }
 0x1fc   : > { %v647_v60 = vadd.f32 %v646_v59, %v601_v58  ;;  %v648_v61 = vpop.f32.mrb[1].mxu1 }
 0x1fd   : > { %v650_v62 = vpop.f32.mrb[2].mxu1  ;;  %v4290_v9 = vadd.f32 %v648_v61, %v605_v8 }
 0x1fe   : > { %948 = vrot.lane.b32.xlu0 %v647_v60, %s3850_s15  ;;  %v651_v63 = vpop.f32.mrb[3].mxu1  ;;  %954 = vrot.lane.b32.xlu1 %v647_v60, %s3851_s28 }
 0x202   : > { %951 = vrot.lane.b32.xlu0 %v647_v60, %s3852_s6 }
 0x209   : > { %v565_v2 = vpop.f32.mrb[0].mxu0 }
 0x20a   : > { %v4272_v3 = vadd.f32 %v3043_v1, %v565_v2  ;;  %v3170_v4 = vpop.f32.mrb[1].mxu0 }
 0x20b   : > { %v568_v5 = vpop.f32.mrb[2].mxu0 }
 0x20c   : > { %657 = vrot.lane.b32.xlu0 %v4272_v3, %s3852_s6  ;;  %654 = vrot.lane.b32.xlu1 %v4272_v3, %s3850_s15  ;;  %v3171_v6 = vpop.f32.mrb[3].mxu0 }
 0x210   : > { %957 = vrot.lane.b32.xlu0 %v647_v60, %s3853_s17  ;;  %660 = vrot.lane.b32.xlu1 %v4272_v3, %s3851_s28 }
 0x214   : > { %963 = vrot.lane.b32.xlu0 %v647_v60, %s3854_s23  ;;  %960 = vrot.lane.b32.xlu1 %v647_v60, %s3855_s12 }
 0x218   : > { %663 = vrot.lane.b32.xlu0 %v4272_v3, %s3853_s17  ;;  %966 = vrot.lane.b32.xlu1 %v647_v60, %s3856_s22 }
 0x21c   : > { %669 = vrot.lane.b32.xlu0 %v4272_v3, %s3854_s23  ;;  %666 = vrot.lane.b32.xlu1 %v4272_v3, %s3855_s12 }
 0x220   : > { %1245 = vrot.lane.b32.xlu0 %v4290_v9, %s3852_s6  ;;  %672 = vrot.lane.b32.xlu1 %v4272_v3, %s3856_s22 }
 0x224   : > { %1242 = vrot.lane.b32.xlu1 %v4290_v9, %s3850_s15 }
 0x228   : > { %1248 = vrot.lane.b32.xlu1 %v4290_v9, %s3851_s28 }
 0x270   : > { %v949_v15 = vpop.permute.xlu0 %948  ;;  %v955_v16 = vpop.permute.xlu1 %954 }
 0x271   : > { %v985_v18 = vcombine.low %v949_v15, %v955_v16  ;;  %v986_v19 = vcombine.high %v949_v15, %v955_v16 }
 0x273   : > { %v993_v22 = vrot.slane %v985_v18, %v4300_v17  ;;  %v1000_v23 = vrot.slane %v986_v19, %v4300_v17 }
 0x274   : > { %v952_v21 = vpop.permute.xlu0 %951 }
 0x275   : > { %v969_v24 = vcombine.low %v647_v60, %v952_v21  ;;  %v970_v25 = vcombine.high %v647_v60, %v952_v21 }
 0x277   : > { %v977_v27 = vrot.slane %v969_v24, %v4300_v17  ;;  %v984_v28 = vrot.slane %v970_v25, %v4300_v17 }
 0x279   : > { %v1033_v29 = vcombine.low %v977_v27, %v993_v22  ;;  %v1034_v30 = vcombine.high %v977_v27, %v993_v22  ;;  %v1049_v31 = vcombine.low %v984_v28, %v1000_v23  ;;  %v1050_v32 = vcombine.high %v984_v28, %v1000_v23 }
 0x27b   : > { %v1041_v33 = vrot.slane %v1033_v29, %v4304_v26  ;;  %v1048_v34 = vrot.slane %v1034_v30, %v4304_v26  ;;  %v1057_v35 = vrot.slane %v1049_v31, %v4304_v26  ;;  %v1064_v36 = vrot.slane %v1050_v32, %v4304_v26 }
 0x27d   : > { %v3053_v37 = vcombine.low %v1041_v33, %v1048_v34  ;;  %v3055_v38 = vcombine.high %v1041_v33, %v1048_v34  ;;  %v3057_v39 = vcombine.low %v1057_v35, %v1064_v36  ;;  %v3059_v40 = vcombine.high %v1057_v35, %v1064_v36 }
 0x27e   : > { %v658_v41 = vpop.permute.xlu0 %657  ;;  %v655_v42 = vpop.permute.xlu1 %654 }
 0x27f   : > { %v1113_v43 = vrot.slane %v3053_v37, %v4300_v17  ;;  %v1129_v44 = vrot.slane %v3055_v38, %v4300_v17  ;;  %v1145_v45 = vrot.slane %v3057_v39, %v4300_v17  ;;  %v1161_v46 = vrot.slane %v3059_v40, %v4300_v17 }
 0x280   : > { %v675_v47 = vcombine.low %v4272_v3, %v658_v41  ;;  %v676_v48 = vcombine.high %v4272_v3, %v658_v41 }
 0x281   : > { %v1169_v49 = vcombine.low %v1113_v43, %v1129_v44  ;;  %v1201_v50 = vcombine.low %v1145_v45, %v1161_v46  ;;  %v1170_v58 = vcombine.high %v1113_v43, %v1129_v44  ;;  %v1202_v59 = vcombine.high %v1145_v45, %v1161_v46 }
 0x282   : > { %v958_v51 = vpop.permute.xlu0 %957  ;;  %v661_v52 = vpop.permute.xlu1 %660  ;;  %v683_v57 = vrot.slane %v675_v47, %v4300_v17  ;;  %v690_v60 = vrot.slane %v676_v48, %v4300_v17 }
 0x283   : > { %v691_v53 = vcombine.low %v655_v42, %v661_v52  ;;  %v692_v54 = vcombine.high %v655_v42, %v661_v52  ;;  %v1177_v55 = vrot.slane %v1169_v49, %v4304_v26  ;;  %v1209_v56 = vrot.slane %v1201_v50, %v4304_v26 }
 0x284   : > { %v1184_v10 = vrot.slane %v1170_v58, %v4304_v26  ;;  %v1216_v11 = vrot.slane %v1202_v59, %v4304_v26 }
 0x285   : > { %v699_v61 = vrot.slane %v691_v53, %v4300_v17  ;;  %v706_v62 = vrot.slane %v692_v54, %v4300_v17  ;;  %v1233_v63 = vcombine.low %v1177_v55, %v1209_v56  ;;  %v1234_v3 = vcombine.high %v1177_v55, %v1209_v56 }
 0x286   : > { %v964_v1 = vpop.permute.xlu0 %963  ;;  %v961_v2 = vpop.permute.xlu1 %960  ;;  %v4332_v30 = vcombine.low %v1184_v10, %v1216_v11  ;;  %v4357_v44 = vcombine.high %v1184_v10, %v1216_v11 }
 0x287   : > { %v739_v4 = vcombine.low %v683_v57, %v699_v61  ;;  %v740_v5 = vcombine.high %v683_v57, %v699_v61  ;;  %v755_v6 = vcombine.low %v690_v60, %v706_v62  ;;  %v756_v7 = vcombine.high %v690_v60, %v706_v62 }
 0x288   : > { %v1543_v8 = vpack.c.bf16 %v1233_v63, %v1233_v63  ;;  %v1001_v16 = vcombine.low %v958_v51, %v964_v1  ;;  %v1002_v18 = vcombine.high %v958_v51, %v964_v1  ;;  %v1544_v22 = vpack.c.bf16 %v1234_v3, %v1234_v3 }
 0x289   : > { %v747_v12 = vrot.slane %v739_v4, %v4304_v26  ;;  %v754_v13 = vrot.slane %v740_v5, %v4304_v26  ;;  %v763_v14 = vrot.slane %v755_v6, %v4304_v26  ;;  %v770_v15 = vrot.slane %v756_v7, %v4304_v26 }
 0x28a   : > { %v1556_v19 = vsel %vm1551_vm2, %v1543_v8, 0  ;;  %v664_v20 = vpop.permute.xlu0 %663  ;;  %v967_v21 = vpop.permute.xlu1 %966  ;;  %v1009_v35 = vrot.slane %v1001_v16, %v4300_v17  ;;  %v1016_v36 = vrot.slane %v1002_v18, %v4300_v17  ;;  %v4355_v43 = vsel %vm1551_vm2, %v1544_v22, 0 }
 0x28b   : > { %v3045_v23 = vcombine.low %v747_v12, %v754_v13  ;;  %v3047_v24 = vcombine.high %v747_v12, %v754_v13  ;;  %v3049_v25 = vcombine.low %v763_v14, %v770_v15  ;;  %v3051_v27 = vcombine.high %v763_v14, %v770_v15  ;;  %3173 = vmatpush3.bf16.xpose.msra.mxu1 %v1556_v19 }
 0x28c   : > { %v1017_v28 = vcombine.low %v961_v2, %v967_v21  ;;  %v1018_v29 = vcombine.high %v961_v2, %v967_v21  ;;  %3178 = vmatprep.subr.bf16.mxu1 %v3847_v0  ;;  %v1545_v52 = vpack.c.bf16 %v4332_v30, %v4332_v30 }
 0x28d   : > { %v4335_v31 = vrot.slane %v3045_v23, %v4300_v17  ;;  %v4338_v32 = vrot.slane %v3047_v24, %v4300_v17  ;;  %v4341_v33 = vrot.slane %v3049_v25, %v4300_v17  ;;  %v4344_v34 = vrot.slane %v3051_v27, %v4300_v17 }
 0x28e   : > { %v1025_v37 = vrot.slane %v1017_v28, %v4300_v17  ;;  %v1032_v38 = vrot.slane %v1018_v29, %v4300_v17  ;;  %v670_v39 = vpop.permute.xlu0 %669  ;;  %v667_v40 = vpop.permute.xlu1 %666 }
 0x28f   : > { %v875_v41 = vcombine.low %v4335_v31, %v4338_v32  ;;  %v907_v42 = vcombine.low %v4341_v33, %v4344_v34  ;;  %v876_v49 = vcombine.high %v4335_v31, %v4338_v32  ;;  %v707_v50 = vcombine.low %v664_v20, %v670_v39 }
 0x290   : > { %v1065_v45 = vcombine.low %v1009_v35, %v1025_v37  ;;  %v1066_v46 = vcombine.high %v1009_v35, %v1025_v37  ;;  %v1081_v47 = vcombine.low %v1016_v36, %v1032_v38  ;;  %v1082_v48 = vcombine.high %v1016_v36, %v1032_v38 }
 0x291   : > { %v708_v51 = vcombine.high %v664_v20, %v670_v39  ;;  %v883_v61 = vrot.slane %v875_v41, %v4304_v26  ;;  %v915_v62 = vrot.slane %v907_v42, %v4304_v26  ;;  %v908_v4 = vcombine.high %v4341_v33, %v4344_v34 }
 0x292   : > { %v1073_v53 = vrot.slane %v1065_v45, %v4304_v26  ;;  %v1080_v54 = vrot.slane %v1066_v46, %v4304_v26  ;;  %v1089_v55 = vrot.slane %v1081_v47, %v4304_v26  ;;  %v1096_v56 = vrot.slane %v1082_v48, %v4304_v26  ;;  %v1246_v57 = vpop.permute.xlu0 %1245  ;;  %v673_v58 = vpop.permute.xlu1 %672 }
 0x293   : > { %v1263_v59 = vcombine.low %v4290_v9, %v1246_v57  ;;  %v1264_v60 = vcombine.high %v4290_v9, %v1246_v57  ;;  %v715_v5 = vrot.slane %v707_v50, %v4300_v17  ;;  %v723_v6 = vcombine.low %v667_v40, %v673_v58 }
 0x294   : > { %v3054_v63 = vcombine.low %v1073_v53, %v1080_v54  ;;  %v3056_v1 = vcombine.high %v1073_v53, %v1080_v54  ;;  %v3058_v2 = vcombine.low %v1089_v55, %v1096_v56  ;;  %v3060_v3 = vcombine.high %v1089_v55, %v1096_v56 }
 0x295   : > { %v724_v7 = vcombine.high %v667_v40, %v673_v58  ;;  %v722_v14 = vrot.slane %v708_v51, %v4300_v17  ;;  %v731_v15 = vrot.slane %v723_v6, %v4300_v17  ;;  %v939_v18 = vcombine.low %v883_v61, %v915_v62 }
 0x296   : > { %v4375_v8 = vrot.slane %v3054_v63, %v4300_v17  ;;  %v4378_v10 = vrot.slane %v3056_v1, %v4300_v17  ;;  %v4381_v11 = vrot.slane %v3058_v2, %v4300_v17  ;;  %v4384_v12 = vrot.slane %v3060_v3, %v4300_v17  ;;  %v1243_v13 = vpop.permute.xlu1 %1242 }
 0x297   : > { %v738_v16 = vrot.slane %v724_v7, %v4300_v17  ;;  %v1271_v19 = vrot.slane %v1263_v59, %v4300_v17  ;;  %v1278_v20 = vrot.slane %v1264_v60, %v4300_v17  ;;  %v771_v23 = vcombine.low %v715_v5, %v731_v15 }
 0x298   : > { %v1186_v21 = vcombine.high %v4375_v8, %v4378_v10  ;;  %v1218_v22 = vcombine.high %v4381_v11, %v4384_v12  ;;  %v772_v24 = vcombine.high %v715_v5, %v731_v15  ;;  %v1535_v28 = vpack.c.bf16 %v939_v18, %v939_v18 }
 0x299   : > { %v787_v25 = vcombine.low %v722_v14, %v738_v16  ;;  %v788_v27 = vcombine.high %v722_v14, %v738_v16  ;;  %v940_v31 = vcombine.high %v883_v61, %v915_v62  ;;  %v779_v34 = vrot.slane %v771_v23, %v4304_v26 }
 0x29a   : > { %v1249_v29 = vpop.permute.xlu1 %1248  ;;  %v4396_v32 = vrot.slane %v1186_v21, %v4304_v26  ;;  %v4399_v33 = vrot.slane %v1218_v22, %v4304_v26  ;;  %v786_v35 = vrot.slane %v772_v24, %v4304_v26  ;;  %3175 = vmatmul.mubr.msk.bf16.vlgmr.msra.gmra.mrb[4].mxu1 %vm1551_vm2, %v1535_v28  ;;  %v4409_v41 = vrot.slane %v876_v49, %v4304_v26 }
 0x29b   : > { %v795_v36 = vrot.slane %v787_v25, %v4304_v26  ;;  %v802_v37 = vrot.slane %v788_v27, %v4304_v26  ;;  %v1279_v38 = vcombine.low %v1243_v13, %v1249_v29  ;;  %v1280_v39 = vcombine.high %v1243_v13, %v1249_v29  ;;  %3179 = vmatpush3.bf16.xpose.msra.mxu1 %v4355_v43 }
 0x29c   : > { %v1239_v40 = vcombine.low %v4396_v32, %v4399_v33  ;;  %v3046_v42 = vcombine.low %v779_v34, %v786_v35  ;;  %v3048_v45 = vcombine.high %v779_v34, %v786_v35  ;;  %3180 = vmatprep.mubr.msk.bf16.mxu1 %vm3849_vm0, %v3847_v0  ;;  %3184 = vmatprep.subr.bf16.mxu1 %v3847_v0  ;;  %v1648_v5 = vsel %vm1551_vm2, %v1545_v52, 0 }
 0x29d   : > { %v3050_v46 = vcombine.low %v795_v36, %v802_v37  ;;  %v3052_v47 = vcombine.high %v795_v36, %v802_v37  ;;  %v1287_v48 = vrot.slane %v1279_v38, %v4300_v17  ;;  %v1294_v50 = vrot.slane %v1280_v39, %v4300_v17 }
 0x29e   : > { %v1549_v51 = vpack.c.bf16 %v1239_v40, %v1239_v40  ;;  %v4418_v53 = vrot.slane %v3046_v42, %v4300_v17  ;;  %v4421_v49 = vrot.slane %v3048_v45, %v4300_v17  ;;  %v1536_v61 = vpack.c.bf16 %v940_v31, %v940_v31 }
 0x29f   : > { %v4424_v54 = vrot.slane %v3050_v46, %v4300_v17  ;;  %v4427_v43 = vrot.slane %v3052_v47, %v4300_v17  ;;  %v1327_v55 = vcombine.low %v1271_v19, %v1287_v48  ;;  %v1328_v56 = vcombine.high %v1271_v19, %v1287_v48 }
 0x2a0   : > { %v1343_v57 = vcombine.low %v1278_v20, %v1294_v50  ;;  %v1344_v58 = vcombine.high %v1278_v20, %v1294_v50  ;;  %v892_v59 = vcombine.high %v4418_v53, %v4421_v49  ;;  %v922_v62 = vrot.slane %v908_v4, %v4304_v26 }
 0x2a1   : > { %v924_v60 = vcombine.high %v4424_v54, %v4427_v43  ;;  %v1335_v63 = vrot.slane %v1327_v55, %v4304_v26  ;;  %v1342_v1 = vrot.slane %v1328_v56, %v4304_v26  ;;  %v1832_v6 = vsel %vm1551_vm2, %v1549_v51, 0 }
 0x2a2   : > { %v1351_v2 = vrot.slane %v1343_v57, %v4304_v26  ;;  %v1358_v3 = vrot.slane %v1344_v58, %v4304_v26  ;;  %v4444_v7 = vrot.slane %v892_v59, %v4304_v26  ;;  %3181 = vmatmul.mubr.msk.bf16.vlgmr.msra.gmra.mrb[8].mxu1 %vm1551_vm2, %v1536_v61  ;;  %3209 = vmatpush3.bf16.xpose.msra.mxu0 %v1832_v6 }
 0x2a3   : > { %v4447_v4 = vrot.slane %v924_v60, %v4304_v26  ;;  %v3061_v13 = vcombine.low %v1335_v63, %v1342_v1  ;;  %v3063_v14 = vcombine.high %v1335_v63, %v1342_v1  ;;  %3185 = vmatpush3.bf16.xpose.msra.mxu1 %v1648_v5  ;;  %v941_v30 = vcombine.low %v4409_v41, %v922_v62 }
 0x2a4   : > { %v3065_v15 = vcombine.low %v1351_v2, %v1358_v3  ;;  %v3067_v16 = vcombine.high %v1351_v2, %v1358_v3  ;;  %v1185_v18 = vcombine.low %v4375_v8, %v4378_v10  ;;  %3186 = vmatprep.mubr.msk.bf16.mxu1 %vm3849_vm0, %v3847_v0  ;;  %3190 = vmatprep.subr.bf16.mxu1 %v3847_v0 }
 0x2a5   : > { %v945_v52 = vcombine.low %v4444_v7, %v4447_v4  ;;  %v1407_v19 = vrot.slane %v3061_v13, %v4300_v17  ;;  %v1423_v20 = vrot.slane %v3063_v14, %v4300_v17  ;;  %v1546_v23 = vpack.c.bf16 %v4357_v44, %v4357_v44  ;;  %3220 = vmatprep.subr.bf16.mxu0 %v3847_v0 }
 0x2a6   : > { %v1439_v21 = vrot.slane %v3065_v15, %v4300_v17  ;;  %v1455_v22 = vrot.slane %v3067_v16, %v4300_v17  ;;  %v1217_v24 = vcombine.low %v4381_v11, %v4384_v12  ;;  %v1193_v10 = vrot.slane %v1185_v18, %v4304_v26 }
 0x2a7   : > { %v1541_v8 = vpack.c.bf16 %v945_v52, %v945_v52  ;;  %v1463_v25 = vcombine.low %v1407_v19, %v1423_v20  ;;  %v1464_v29 = vcombine.high %v1407_v19, %v1423_v20  ;;  %v1537_v31 = vpack.c.bf16 %v941_v30, %v941_v30 }
 0x2a8   : > { %v1495_v27 = vcombine.low %v1439_v21, %v1455_v22  ;;  %v1225_v28 = vrot.slane %v1217_v24, %v4304_v26  ;;  %v1694_v44 = vsel %vm1551_vm2, %v1546_v23, 0  ;;  %v891_v36 = vcombine.low %v4418_v53, %v4421_v49 }
 0x2a9   : > { %v1471_v34 = vrot.slane %v1463_v25, %v4304_v26  ;;  %3211 = vmatmul.mubr.msk.bf16.vlgmr.msra.gmra.mrb[4].mxu0 %vm1551_vm2, %v1541_v8  ;;  %v923_v37 = vcombine.low %v4424_v54, %v4427_v43  ;;  %v942_v38 = vcombine.high %v4409_v41, %v922_v62  ;;  %v1478_v40 = vrot.slane %v1464_v29, %v4304_v26 }
 0x2aa   : > { %v1503_v35 = vrot.slane %v1495_v27, %v4304_v26  ;;  %3187 = vmatmul.mubr.msk.bf16.vlgmr.msra.gmra.mrb[12].mxu1 %vm1551_vm2, %v1537_v31  ;;  %v1237_v11 = vcombine.low %v1193_v10, %v1225_v28  ;;  %3222 = vmatprep.mubr.msk.bf16.mxu0 %vm3849_vm0, %v3847_v0  ;;  %v1496_v42 = vcombine.high %v1439_v21, %v1455_v22 }
 0x2ab   : > { %3191 = vmatpush3.bf16.xpose.msra.mxu1 %v1694_v44  ;;  %3192 = vmatprep.mubr.msk.bf16.mxu1 %vm3849_vm0, %v3847_v0  ;;  %v1538_v48 = vpack.c.bf16 %v942_v38, %v942_v38  ;;  %v899_v50 = vrot.slane %v891_v36, %v4304_v26  ;;  %v931_v41 = vrot.slane %v923_v37, %v4304_v26 }
 0x2ac   : > { %v1527_v12 = vcombine.low %v1471_v34, %v1503_v35  ;;  %3196 = vmatprep.subr.bf16.mxu1 %v3847_v0  ;;  %v1547_v45 = vpack.c.bf16 %v1237_v11, %v1237_v11  ;;  %v1510_v47 = vrot.slane %v1496_v42, %v4304_v26  ;;  %v1238_v54 = vcombine.high %v1193_v10, %v1225_v28 }
 0x2ad   : > { %v943_v43 = vcombine.low %v899_v50, %v931_v41  ;;  %v1240_v58 = vcombine.high %v4396_v32, %v4399_v33  ;;  %v944_v59 = vcombine.high %v899_v50, %v931_v41  ;;  %v1528_v63 = vcombine.high %v1471_v34, %v1503_v35 }
 0x2ae   : > { %v2017_v39 = vpack.c.bf16 %v1527_v12, %v1527_v12  ;;  %v4490_v51 = vcombine.low %v1478_v40, %v1510_v47  ;;  %v4492_v53 = vcombine.high %v1478_v40, %v1510_v47  ;;  %v1740_v49 = vsel %vm1551_vm2, %v1547_v45, 0 }
 0x2af   : > { %v1548_v55 = vpack.c.bf16 %v1238_v54, %v1238_v54  ;;  %v1539_v56 = vpack.c.bf16 %v943_v43, %v943_v43  ;;  %v1550_v60 = vpack.c.bf16 %v1240_v58, %v1240_v58  ;;  %v1540_v61 = vpack.c.bf16 %v944_v59, %v944_v59 }
 0x2b0   : > { %v2030_v46 = vsel %vm2028_vm3, %v2017_v39, 0  ;;  %v946_v32 = vcombine.high %v4444_v7, %v4447_v4  ;;  %v2018_v33 = vpack.c.bf16 %v1528_v63, %v1528_v63 }
 0x2b1   : > { %3221 = vmatpush3.bf16.msra.mxu0 %v2030_v46  ;;  %v1786_v57 = vsel %vm1551_vm2, %v1548_v55, 0  ;;  %v1878_v62 = vsel %vm1551_vm2, %v1550_v60, 0 }
 0x2b2   : > { %3232 = vmatprep.subr.bf16.mxu0 %v3847_v0  ;;  %3193 = vmatmul.mubr.msk.bf16.vlgmr.msra.gmra.mrb[16].mxu1 %vm1551_vm2, %v1538_v48  ;;  %v1542_v1 = vpack.c.bf16 %v946_v32, %v946_v32  ;;  %v2076_v2 = vsel %vm2028_vm3, %v2018_v33, 0 }
 0x2b3   : > { %3197 = vmatpush3.bf16.xpose.msra.mxu1 %v1740_v49  ;;  %3198 = vmatprep.mubr.msk.bf16.mxu1 %vm3849_vm0, %v3847_v0 }
 0x2b4   : > { %3202 = vmatprep.subr.bf16.mxu1 %v3847_v0 }
 0x2ba   : > { %3199 = vmatmul.mubr.msk.bf16.vlgmr.msra.gmra.mrb[20].mxu1 %vm1551_vm2, %v1539_v56 }
 0x2bb   : > { %3203 = vmatpush3.bf16.xpose.msra.mxu1 %v1786_v57  ;;  %3204 = vmatprep.mubr.msk.bf16.mxu1 %vm3849_vm0, %v3847_v0 }
 0x2bc   : > { %3214 = vmatprep.subr.bf16.mxu1 %v3847_v0 }
 0x2c2   : > { %3205 = vmatmul.mubr.msk.bf16.vlgmr.msra.gmra.mrb[24].mxu1 %vm1551_vm2, %v1540_v61 }
 0x2c3   : > { %3215 = vmatpush3.bf16.xpose.msra.mxu1 %v1878_v62  ;;  %3216 = vmatprep.mubr.msk.bf16.mxu1 %vm3849_vm0, %v3847_v0 }
 0x2c4   : > { %3226 = vmatprep.subr.bf16.mxu1 %v3847_v0 }
 0x2ca   : > { %3217 = vmatmul.mubr.msk.bf16.vlgmr.msra.gmra.mrb[28].mxu1 %vm1551_vm2, %v1542_v1 }
 0x2cb   : > { %3227 = vmatpush3.bf16.msra.mxu1 %v2076_v2  ;;  %3228 = vmatprep.mubr.msk.bf16.mxu1 %vm3849_vm0, %v3847_v0 }
 0x2cc   : > { %3238 = vmatprep.subr.bf16.mxu1 %v3847_v0 }
 0x36d   : > { %v1592_v3 = vpop.f32.mrb[4].mxu1 }
 0x36e   : > { %v3176_v5 = vpop.f32.mrb[5].mxu1  ;;  %v1921_v6 = vsel %vm1920_vm4, %v1592_v3, -inf }
 0x36f   : > { %1922 = vmax.xlane.f32.xlu0 %v1921_v6  ;;  %v1595_v13 = vpop.f32.mrb[6].mxu1 }
 0x370   : > { %v3177_v7 = vpop.f32.mrb[7].mxu1 }
 0x375   : > { %v1638_v4 = vpop.f32.mrb[8].mxu1 }
 0x376   : > { %v3182_v14 = vpop.f32.mrb[9].mxu1  ;;  %v1924_v10 = vsel %vm1920_vm4, %v1638_v4, -inf }
 0x377   : > { %v1641_v15 = vpop.f32.mrb[10].mxu1 }
 0x378   : > { %v3183_v16 = vpop.f32.mrb[11].mxu1 }
 0x37c   : > { %v4519_v52 = vpop.f32.mrb[4].mxu0 }
 0x37d   : > { %v1684_v30 = vpop.f32.mrb[12].mxu1  ;;  %v3212_v19 = vpop.f32.mrb[5].mxu0  ;;  %v1939_v21 = vsel %vm1920_vm4, %v4519_v52, -inf }
 0x37e   : > { %v3188_v18 = vpop.f32.mrb[13].mxu1  ;;  %v1927_v20 = vsel %vm1920_vm4, %v1684_v30, -inf  ;;  %1940 = vmax.xlane.f32.xlu1 %v1939_v21  ;;  %v1871_v23 = vpop.f32.mrb[6].mxu0 }
 0x37f   : > { %1928 = vmax.xlane.f32.xlu0 %v1927_v20  ;;  %v1687_v22 = vpop.f32.mrb[14].mxu1  ;;  %v3213_v8 = vpop.f32.mrb[7].mxu0 }
 0x380   : > { %v3189_v24 = vpop.f32.mrb[15].mxu1 }
 0x382   : > { %1925 = vmax.xlane.f32.xlu1 %v1924_v10 }
 0x385   : > { %v1730_v25 = vpop.f32.mrb[16].mxu1 }
 0x386   : > { %v3194_v27 = vpop.f32.mrb[17].mxu1  ;;  %v1930_v28 = vsel %vm1920_vm4, %v1730_v25, -inf }
 0x387   : > { %1931 = vmax.xlane.f32.xlu0 %v1930_v28  ;;  %v1733_v29 = vpop.f32.mrb[18].mxu1 }
 0x388   : > { %v3195_v31 = vpop.f32.mrb[19].mxu1 }
 0x38d   : > { %v1776_v34 = vpop.f32.mrb[20].mxu1 }
 0x38e   : > { %v3200_v35 = vpop.f32.mrb[21].mxu1  ;;  %v1933_v44 = vsel %vm1920_vm4, %v1776_v34, -inf }
 0x38f   : > { %v1779_v11 = vpop.f32.mrb[22].mxu1  ;;  %1934 = vmax.xlane.f32.xlu1 %v1933_v44 }
 0x390   : > { %v3201_v12 = vpop.f32.mrb[23].mxu1 }
 0x395   : > { %v1822_v36 = vpop.f32.mrb[24].mxu1 }
 0x396   : > { %v3206_v37 = vpop.f32.mrb[25].mxu1  ;;  %v1936_v38 = vsel %vm1920_vm4, %v1822_v36, -inf }
 0x397   : > { %1937 = vmax.xlane.f32.xlu0 %v1936_v38  ;;  %v1825_v39 = vpop.f32.mrb[26].mxu1 }
 0x398   : > { %v3207_v40 = vpop.f32.mrb[27].mxu1 }
 0x39d   : > { %v1914_v42 = vpop.f32.mrb[28].mxu1 }
 0x39e   : > { %v3218_v45 = vpop.f32.mrb[29].mxu1  ;;  %v1942_v46 = vsel %vm1920_vm4, %v1914_v42, -inf }
 0x39f   : > { %1943 = vmax.xlane.f32.xlu0 %v1942_v46  ;;  %v1917_v47 = vpop.f32.mrb[30].mxu1  ;;  %v2020_v46 = vpack.c.bf16 %v4492_v53, %v4492_v53 }
 0x3a0   : > { %v3219_v48 = vpop.f32.mrb[31].mxu1  ;;  %1254 = vrot.lane.b32.xlu1 %v4290_v9, %s3855_s12 }
 0x3b5   : > { %1251 = vrot.lane.b32.xlu0 %v4290_v9, %s3853_s17 }
 0x3fc   : > { %v1923_v50 = vpop.xlane.xlu0 %1922 }
 0x3fd   : > { %v1945_v41 = vsub.f32 %v1592_v3, %v1923_v50 }
 0x3ff   : > { %v1953_v49 = vmul.f32 1.442695, %v1945_v41  ;;  %v2168_v41 = vsel %vm2028_vm3, %v2020_v46, 0 }
 0x401   : > { %3439 = vpow2.f32 %v1953_v49 }
 0x40b   : > { %v3440_v54 = vpop.eup %3439  ;;  %v1941_v55 = vpop.xlane.xlu1 %1940 }
 0x40c   : > { %v1929_v43 = vpop.xlane.xlu0 %1928  ;;  %v1969_v56 = vsel %vm1920_vm4, %v3440_v54, 0.0  ;;  %v1951_v58 = vsub.f32 %v4519_v52, %v1941_v55 }
 0x40d   : > { %v1947_v57 = vsub.f32 %v1684_v30, %v1929_v43  ;;  %1970 = vadd.xlane.f32.xlu1 %v1969_v56 }
 0x40e   : > { %v1965_v24 = vmul.f32 1.442695, %v1951_v58 }
 0x40f   : > { %v1957_v59 = vmul.f32 1.442695, %v1947_v57  ;;  %v1926_v60 = vpop.xlane.xlu1 %1925 }
 0x410   : > { %v1946_v61 = vsub.f32 %v1638_v4, %v1926_v60 }
 0x411   : > { %3441 = vpow2.f32 %v1957_v59 }
 0x412   : > { %v1955_v62 = vmul.f32 1.442695, %v1946_v61 }
 0x414   : > { %v1932_v63 = vpop.xlane.xlu0 %1931  ;;  %3443 = vpow2.f32 %v1955_v62 }
 0x415   : > { %v1948_v32 = vsub.f32 %v1730_v25, %v1932_v63 }
 0x417   : > { %v1959_v33 = vmul.f32 1.442695, %v1948_v32 }
 0x419   : > { %3445 = vpow2.f32 %v1959_v33 }
 0x41b   : > { %v3442_v1 = vpop.eup %3441 }
 0x41c   : > { %v1935_v2 = vpop.xlane.xlu1 %1934  ;;  %v1975_v3 = vsel %vm1920_vm4, %v3442_v1, 0.0 }
 0x41d   : > { %v1949_v5 = vsub.f32 %v1776_v34, %v1935_v2  ;;  %1976 = vadd.xlane.f32.xlu1 %v1975_v3  ;;  %v2019_v34 = vpack.c.bf16 %v4490_v51, %v4490_v51 }
 0x41e   : > { %v3444_v6 = vpop.eup %3443 }
 0x41f   : > { %v1961_v13 = vmul.f32 1.442695, %v1949_v5  ;;  %v1972_v7 = vsel %vm1920_vm4, %v3444_v6, 0.0  ;;  %v2122_v11 = vsel %vm2028_vm3, %v2019_v34, 0 }
 0x420   : > { %1973 = vadd.xlane.f32.xlu0 %v1972_v7 }
 0x421   : > { %3447 = vpow2.f32 %v1961_v13 }
 0x423   : > { %v4537_v14 = vpop.eup %3445 }
 0x424   : > { %v1938_v4 = vpop.xlane.xlu0 %1937  ;;  %v1978_v15 = vsel %vm1920_vm4, %v4537_v14, 0.0 }
 0x425   : > { %v1950_v16 = vsub.f32 %v1822_v36, %v1938_v4  ;;  %1979 = vadd.xlane.f32.xlu0 %v1978_v15 }
 0x427   : > { %v1963_v30 = vmul.f32 1.442695, %v1950_v16 }
 0x429   : > { %3449 = vpow2.f32 %v1963_v30 }
 0x42b   : > { %v4541_v52 = vpop.eup %3447 }
 0x42c   : > { %v1981_v18 = vsel %vm1920_vm4, %v4541_v52, 0.0  ;;  %v1944_v21 = vpop.xlane.xlu0 %1943 }
 0x42d   : > { %1982 = vadd.xlane.f32.xlu0 %v1981_v18  ;;  %v1952_v22 = vsub.f32 %v1914_v42, %v1944_v21 }
 0x42f   : > { %v1967_v23 = vmul.f32 1.442695, %v1952_v22 }
 0x430   : > { %v1252_v44 = vpop.permute.xlu0 %1251 }
 0x431   : > { %3451 = vpow2.f32 %v1967_v23 }
 0x432   : > { %3453 = vpow2.f32 %v1965_v24 }
 0x433   : > { %v4545_v19 = vpop.eup %3449 }
 0x434   : > { %v1984_v20 = vsel %vm1920_vm4, %v4545_v19, 0.0 }
 0x435   : > { %1985 = vadd.xlane.f32.xlu1 %v1984_v20 }
 0x43b   : > { %v4553_v8 = vpop.eup %3451 }
 0x43c   : > { %v1990_v10 = vsel %vm1920_vm4, %v4553_v8, 0.0  ;;  %v4557_v25 = vpop.eup %3453 }
 0x43d   : > { %v1987_v27 = vsel %vm1920_vm4, %v4557_v25, 0.0 }
 0x443   : > { %1260 = vrot.lane.b32.xlu0 %v4290_v9, %s3856_s22 }
 0x446   : > { %1257 = vrot.lane.b32.xlu1 %v4290_v9, %s3854_s23  ;;  %v1255_v9 = vpop.permute.xlu1 %1254 }
 0x462   : > { %1991 = vadd.xlane.f32.xlu0 %v1990_v10 }
 0x46a   : > { %1988 = vadd.xlane.f32.xlu1 %v1987_v27 }
 0x49a   : > { %v1971_v28 = vpop.xlane.xlu1 %1970 }
 0x49b   : > { %3455 = vrcp.f32 %v1971_v28 }
 0x4a5   : > { %v3456_v29 = vpop.eup %3455 }
 0x4a6   : > { %v1994_v31 = vmul.f32 %v3456_v29, %v3440_v54 }
 0x4a8   : > { %2779 = vst.msk [vmem:[%s4564_s2] sm:$0xff] %vm1920_vm4, %v1994_v31  ;;  %v2009_v35 = vpack.c.bf16 %v1994_v31, %v1994_v31 }
 0x4aa   : > { %3223 = vmatmul.mubr.msk.bf16.vlgmr.msra.gmra.mrb[8].mxu0 %vm1920_vm4, %v2009_v35  ;;  %v1977_v12 = vpop.xlane.xlu1 %1976 }
 0x4ab   : > { %3233 = vmatpush3.bf16.msra.mxu0 %v2122_v11  ;;  %3457 = vrcp.f32 %v1977_v12  ;;  %3234 = vmatprep.mubr.msk.bf16.mxu0 %vm3849_vm0, %v3847_v0 }
 0x4ac   : > { %3244 = vmatprep.subr.bf16.mxu0 %v3847_v0 }
 0x4ad   : > { %v1974_v51 = vpop.xlane.xlu0 %1973 }
 0x4ae   : > { %3459 = vrcp.f32 %v1974_v51 }
 0x4b2   : > { %v1980_v36 = vpop.xlane.xlu0 %1979 }
 0x4b3   : > { %3461 = vrcp.f32 %v1980_v36 }
 0x4b5   : > { %v3458_v37 = vpop.eup %3457 }
 0x4b6   : > { %v1998_v38 = vmul.f32 %v3458_v37, %v3442_v1 }
 0x4b8   : > { %2781 = vst.msk [vmem:[%s4564_s2 + $0x10] sm:$0xff] %vm1920_vm4, %v1998_v38  ;;  %v2011_v39 = vpack.c.bf16 %v1998_v38, %v1998_v38  ;;  %v3460_v40 = vpop.eup %3459 }
 0x4b9   : > { %v1996_v42 = vmul.f32 %v3460_v40, %v3444_v6 }
 0x4ba   : > { %v1983_v45 = vpop.xlane.xlu0 %1982  ;;  %3235 = vmatmul.mubr.msk.bf16.vlgmr.msra.gmra.mrb[12].mxu0 %vm1920_vm4, %v2011_v39 }
 0x4bb   : > { %3463 = vrcp.f32 %v1983_v45  ;;  %3246 = vmatprep.mubr.msk.bf16.mxu0 %vm3849_vm0, %v3847_v0  ;;  %2780 = vst.msk [vmem:[%s4564_s2 + $0x8] sm:$0xff] %vm1920_vm4, %v1996_v42  ;;  %v2010_v47 = vpack.c.bf16 %v1996_v42, %v1996_v42 }
 0x4bd   : > { %v3462_v48 = vpop.eup %3461  ;;  %3229 = vmatmul.mubr.msk.bf16.vlgmr.msra.gmra.mrb[32].mxu1 %vm1920_vm4, %v2010_v47 }
 0x4be   : > { %v2000_v50 = vmul.f32 %v3462_v48, %v4537_v14  ;;  %3239 = vmatpush3.bf16.msra.mxu1 %v2168_v41  ;;  %3240 = vmatprep.mubr.msk.bf16.mxu1 %vm3849_vm0, %v3847_v0  ;;  %v1261_v53 = vpop.permute.xlu0 %1260 }
 0x4bf   : > { %3250 = vmatprep.subr.bf16.mxu1 %v3847_v0  ;;  %v1311_v55 = vcombine.low %v1255_v9, %v1261_v53  ;;  %v1312_v56 = vcombine.high %v1255_v9, %v1261_v53 }
 0x4c0   : > { %2782 = vst.msk [vmem:[%s4564_s2 + $0x18] sm:$0xff] %vm1920_vm4, %v2000_v50  ;;  %v2012_v54 = vpack.c.bf16 %v2000_v50, %v2000_v50 }
 0x4c1   : > { %v1319_v61 = vrot.slane %v1311_v55, %v4300_v17  ;;  %v1326_v62 = vrot.slane %v1312_v56, %v4300_v17 }
 0x4c2   : > { %v1986_v49 = vpop.xlane.xlu1 %1985 }
 0x4c3   : > { %3465 = vrcp.f32 %v1986_v49 }
 0x4c5   : > { %v3464_v43 = vpop.eup %3463  ;;  %3241 = vmatmul.mubr.msk.bf16.vlgmr.msra.gmra.mrb[36].mxu1 %vm1920_vm4, %v2012_v54 }
 0x4c6   : > { %v2002_v57 = vmul.f32 %v3464_v43, %v4541_v52  ;;  %v1258_v58 = vpop.permute.xlu1 %1257  ;;  %3252 = vmatprep.mubr.msk.bf16.mxu1 %vm3849_vm0, %v3847_v0 }
 0x4c7   : > { %v1295_v59 = vcombine.low %v1252_v44, %v1258_v58  ;;  %v1296_v60 = vcombine.high %v1252_v44, %v1258_v58 }
 0x4c8   : > { %2783 = vst.msk [vmem:[%s4564_s2 + $0x20] sm:$0xff] %vm1920_vm4, %v2002_v57  ;;  %v2013_v39 = vpack.c.bf16 %v2002_v57, %v2002_v57 }
 0x4c9   : > { %v1303_v63 = vrot.slane %v1295_v59, %v4300_v17  ;;  %v1310_v32 = vrot.slane %v1296_v60, %v4300_v17 }
 0x4cb   : > { %v1359_v33 = vcombine.low %v1303_v63, %v1319_v61  ;;  %v1360_v1 = vcombine.high %v1303_v63, %v1319_v61  ;;  %v1375_v2 = vcombine.low %v1310_v32, %v1326_v62  ;;  %v1376_v3 = vcombine.high %v1310_v32, %v1326_v62 }
 0x4cd   : > { %v3466_v5 = vpop.eup %3465  ;;  %v1367_v6 = vrot.slane %v1359_v33, %v4304_v26  ;;  %v1374_v13 = vrot.slane %v1360_v1, %v4304_v26  ;;  %v1383_v7 = vrot.slane %v1375_v2, %v4304_v26  ;;  %v1390_v14 = vrot.slane %v1376_v3, %v4304_v26 }
 0x4ce   : > { %v2004_v4 = vmul.f32 %v3466_v5, %v4545_v19 }
 0x4cf   : > { %v3062_v15 = vcombine.low %v1367_v6, %v1374_v13  ;;  %v3064_v16 = vcombine.high %v1367_v6, %v1374_v13  ;;  %v3066_v30 = vcombine.low %v1383_v7, %v1390_v14  ;;  %v3068_v52 = vcombine.high %v1383_v7, %v1390_v14 }
 0x4d0   : > { %2784 = vst.msk [vmem:[%s4564_s2 + $0x28] sm:$0xff] %vm1920_vm4, %v2004_v4  ;;  %v2014_v40 = vpack.c.bf16 %v2004_v4, %v2004_v4 }
 0x4d1   : > { %v1414_v18 = vrot.slane %v3062_v15, %v4300_v17  ;;  %v1430_v20 = vrot.slane %v3064_v16, %v4300_v17  ;;  %v1446_v21 = vrot.slane %v3066_v30, %v4300_v17  ;;  %v1462_v22 = vrot.slane %v3068_v52, %v4300_v17 }
 0x4d3   : > { %v1479_v23 = vcombine.low %v1414_v18, %v1430_v20  ;;  %v1511_v24 = vcombine.low %v1446_v21, %v1462_v22  ;;  %v1480_v10 = vcombine.high %v1414_v18, %v1430_v20  ;;  %v1512_v27 = vcombine.high %v1446_v21, %v1462_v22 }
 0x4d5   : > { %v1487_v19 = vrot.slane %v1479_v23, %v4304_v26  ;;  %v1519_v9 = vrot.slane %v1511_v24, %v4304_v26  ;;  %v1494_v28 = vrot.slane %v1480_v10, %v4304_v26  ;;  %v1526_v29 = vrot.slane %v1512_v27, %v4304_v26 }
 0x4d7   : > { %v1531_v31 = vcombine.low %v1487_v19, %v1519_v9  ;;  %v1532_v34 = vcombine.high %v1487_v19, %v1519_v9  ;;  %v1533_v35 = vcombine.low %v1494_v28, %v1526_v29  ;;  %v1534_v44 = vcombine.high %v1494_v28, %v1526_v29  ;;  %v2707_v9 = vld [vmem:[#allocation13] sm:$0xff]  ;;  %v2708_v28 = vld [vmem:[#allocation13 + $0x8] sm:$0xff] }
 0x4d9   : > { %v2021_v11 = vpack.c.bf16 %v1531_v31, %v1531_v31  ;;  %v2022_v12 = vpack.c.bf16 %v1532_v34, %v1532_v34  ;;  %v2023_v37 = vpack.c.bf16 %v1533_v35, %v1533_v35  ;;  %v2024_v38 = vpack.c.bf16 %v1534_v44, %v1534_v44  ;;  %v2709_v44 = vld [vmem:[#allocation13 + $0x10] sm:$0xff] }
 0x4db   : > { %v2214_v51 = vsel %vm2028_vm3, %v2021_v11, 0  ;;  %v2260_v36 = vsel %vm2028_vm3, %v2022_v12, 0  ;;  %v2306_v42 = vsel %vm2028_vm3, %v2023_v37, 0  ;;  %v2352_v45 = vsel %vm2028_vm3, %v2024_v38, 0  ;;  %v2710_v11 = vld [vmem:[#allocation13 + $0x18] sm:$0xff] }
 0x4dc   : > { %3245 = vmatpush3.bf16.msra.mxu0 %v2214_v51  ;;  %3251 = vmatpush3.bf16.msra.mxu1 %v2260_v36  ;;  %v2723_v12 = vpack.c.bf16 %v2708_v28, %v2707_v9  ;;  %v2719_v28 = vld [vmem:[#allocation13 + $0x60] sm:$0xff] }
 0x4dd   : > { %3256 = vmatprep.subr.bf16.mxu0 %v3847_v0  ;;  %3262 = vmatprep.subr.bf16.mxu1 %v3847_v0 }
 0x4df   : > { %3247 = vmatmul.mubr.msk.bf16.vlgmr.msra.gmra.mrb[16].mxu0 %vm1920_vm4, %v2013_v39  ;;  %3253 = vmatmul.mubr.msk.bf16.vlgmr.msra.gmra.mrb[40].mxu1 %vm1920_vm4, %v2014_v40  ;;  %v2724_v39 = vpack.c.bf16 %v2710_v11, %v2709_v44 }
 0x4e0   : > { %3257 = vmatpush3.bf16.msra.mxu0 %v2306_v42  ;;  %3263 = vmatpush3.bf16.msra.mxu1 %v2352_v45 }
 0x4e1   : > { %3264 = vmatprep.mubr.msk.bf16.mxu1 %vm3849_vm0, %v3847_v0  ;;  %3258 = vmatprep.mubr.msk.bf16.mxu0 %vm3849_vm0, %v3847_v0 }
 0x4e2   : > { %3268 = vmatprep.subr.bf16.mxu0 %v3847_v0 }
 0x4ef   : > { %v1992_v46 = vpop.xlane.xlu0 %1991 }
 0x4f0   : > { %3467 = vrcp.f32 %v1992_v46 }
 0x4f7   : > { %v1989_v47 = vpop.xlane.xlu1 %1988 }
 0x4f8   : > { %3469 = vrcp.f32 %v1989_v47  ;;  %v2711_v47 = vld [vmem:[#allocation13 + $0x20] sm:$0xff] }
 0x4fa   : > { %v3468_v48 = vpop.eup %3467 }
 0x4fb   : > { %v2008_v50 = vmul.f32 %v3468_v48, %v4553_v8  ;;  %v2712_v48 = vld [vmem:[#allocation13 + $0x28] sm:$0xff] }
 0x4fd   : > { %2786 = vst.msk [vmem:[%s4564_s2 + $0x38] sm:$0xff] %vm1920_vm4, %v2008_v50  ;;  %v2016_v41 = vpack.c.bf16 %v2008_v50, %v2008_v50 }
 0x4ff   : > { %3265 = vmatmul.mubr.msk.bf16.vlgmr.msra.gmra.mrb[44].mxu1 %vm1920_vm4, %v2016_v41 }
 0x502   : > { %v3470_v53 = vpop.eup %3469 }
 0x503   : > { %v2006_v49 = vmul.f32 %v3470_v53, %v4557_v25 }
 0x505   : > { %2785 = vst.msk [vmem:[%s4564_s2 + $0x30] sm:$0xff] %vm1920_vm4, %v2006_v49  ;;  %v2015_v54 = vpack.c.bf16 %v2006_v49, %v2006_v49 }
 0x507   : > { %3259 = vmatmul.mubr.msk.bf16.vlgmr.msra.gmra.mrb[20].mxu0 %vm1920_vm4, %v2015_v54  ;;  %v2725_v54 = vpack.c.bf16 %v2712_v48, %v2711_v47  ;;  %v2721_v47 = vld [vmem:[#allocation13 + $0x70] sm:$0xff]  ;;  %v2722_v48 = vld [vmem:[#allocation13 + $0x78] sm:$0xff] }
 0x508   : > { %3284 = vmatprep.mubr.msk.bf16.mxu0 %vm3849_vm0, %v3847_v0  ;;  %3269 = vmatpush3.bf16.msra.mxu0 %v2723_v12 }
 0x509   : > { %3270 = vmatprep.subr.bf16.mxu0 %v3847_v0 }
 0x50c   : > { %3271 = vmatpush3.bf16.msra.mxu0 %v2724_v39 }
 0x50d   : > { %3272 = vmatprep.subr.bf16.mxu0 %v3847_v0 }
 0x510   : > { %3273 = vmatpush3.bf16.msra.mxu0 %v2725_v54 }
 0x511   : > { %3274 = vmatprep.subr.bf16.mxu0 %v3847_v0 }
 0x57d   : > { %v2066_v43 = vpop.f32.mrb[8].mxu0 }
 0x57e   : > { %v3224_v55 = vpop.f32.mrb[9].mxu0 }
 0x57f   : > { %v2069_v56 = vpop.f32.mrb[10].mxu0  ;;  %v2714_v55 = vld [vmem:[#allocation13 + $0x38] sm:$0xff] }
 0x580   : > { %v3225_v8 = vpop.f32.mrb[11].mxu0 }
 0x581   : > { %v2715_v8 = vld [vmem:[#allocation13 + $0x40] sm:$0xff] }
 0x58d   : > { %v2158_v57 = vpop.f32.mrb[12].mxu0 }
 0x58e   : > { %v2394_v58 = vcombine.low %v2066_v43, %v2158_v57  ;;  %v2395_v59 = vcombine.high %v2066_v43, %v2158_v57  ;;  %v3236_v60 = vpop.f32.mrb[13].mxu0  ;;  %v2713_v43 = vld [vmem:[#allocation13 + $0x30] sm:$0xff]  ;;  %v2716_v57 = vld [vmem:[#allocation13 + $0x48] sm:$0xff] }
 0x58f   : > { %v2161_v61 = vpop.f32.mrb[14].mxu0  ;;  %v2726_v56 = vpack.c.bf16 %v2714_v55, %v2713_v43  ;;  %v2730_v43 = vpack.c.bf16 %v2722_v48, %v2721_v47 }
 0x590   : > { %v3237_v62 = vpop.f32.mrb[15].mxu0  ;;  %v2112_v63 = vpop.f32.mrb[32].mxu1  ;;  %v2402_v13 = vrot.slane %v2394_v58, %v4300_v17  ;;  %v2409_v7 = vrot.slane %v2395_v59, %v4300_v17 }
 0x591   : > { %v3230_v25 = vpop.f32.mrb[33].mxu1  ;;  %3275 = vmatpush3.bf16.msra.mxu0 %v2726_v56  ;;  %v2727_v62 = vpack.c.bf16 %v2716_v57, %v2715_v8 }
 0x592   : > { %v2115_v32 = vpop.f32.mrb[34].mxu1  ;;  %3276 = vmatprep.subr.bf16.mxu0 %v3847_v0 }
 0x593   : > { %v3231_v33 = vpop.f32.mrb[35].mxu1  ;;  %v2717_v32 = vld [vmem:[#allocation13 + $0x50] sm:$0xff] }
 0x594   : > { %v2718_v33 = vld [vmem:[#allocation13 + $0x58] sm:$0xff] }
 0x595   : > { %3277 = vmatpush3.bf16.msra.mxu0 %v2727_v62 }
 0x596   : > { %3278 = vmatprep.subr.bf16.mxu0 %v3847_v0 }
 0x598   : > { %v2204_v1 = vpop.f32.mrb[36].mxu1 }
 0x599   : > { %v2410_v2 = vcombine.low %v2112_v63, %v2204_v1  ;;  %v2411_v3 = vcombine.high %v2112_v63, %v2204_v1  ;;  %v3242_v5 = vpop.f32.mrb[37].mxu1 }
 0x59a   : > { %v2207_v6 = vpop.f32.mrb[38].mxu1 }
 0x59b   : > { %v2418_v14 = vrot.slane %v2410_v2, %v4300_v17  ;;  %v2425_v4 = vrot.slane %v2411_v3, %v4300_v17  ;;  %v3243_v15 = vpop.f32.mrb[39].mxu1  ;;  %v2728_v3 = vpack.c.bf16 %v2718_v33, %v2717_v32 }
 0x59d   : > { %v2458_v16 = vcombine.low %v2402_v13, %v2418_v14  ;;  %v2459_v30 = vcombine.high %v2402_v13, %v2418_v14  ;;  %v2474_v52 = vcombine.low %v2409_v7, %v2425_v4  ;;  %v2475_v18 = vcombine.high %v2409_v7, %v2425_v4  ;;  %3279 = vmatpush3.bf16.msra.mxu0 %v2728_v3 }
 0x59e   : > { %3280 = vmatprep.subr.bf16.mxu0 %v3847_v0 }
 0x59f   : > { %v2466_v20 = vrot.slane %v2458_v16, %v4304_v26  ;;  %v2473_v21 = vrot.slane %v2459_v30, %v4304_v26  ;;  %v2482_v22 = vrot.slane %v2474_v52, %v4304_v26  ;;  %v2489_v23 = vrot.slane %v2475_v18, %v4304_v26 }
 0x5a1   : > { %v3085_v24 = vcombine.low %v2466_v20, %v2473_v21  ;;  %v3087_v10 = vcombine.high %v2466_v20, %v2473_v21  ;;  %v3089_v27 = vcombine.low %v2482_v22, %v2489_v23  ;;  %v3091_v19 = vcombine.high %v2482_v22, %v2489_v23 }
 0x5a3   : > { %v2538_v29 = vrot.slane %v3085_v24, %v4300_v17  ;;  %v2554_v31 = vrot.slane %v3087_v10, %v4300_v17  ;;  %v2570_v34 = vrot.slane %v3089_v27, %v4300_v17  ;;  %v2586_v35 = vrot.slane %v3091_v19, %v4300_v17 }
 0x5a5   : > { %v2595_v51 = vcombine.high %v2538_v29, %v2554_v31  ;;  %v2627_v36 = vcombine.high %v2570_v34, %v2586_v35  ;;  %v2594_v37 = vcombine.low %v2538_v29, %v2554_v31  ;;  %v2626_v38 = vcombine.low %v2570_v34, %v2586_v35  ;;  %v2720_v29 = vld [vmem:[#allocation13 + $0x68] sm:$0xff] }
 0x5a6   : > { %v2729_v11 = vpack.c.bf16 %v2720_v29, %v2719_v28 }
 0x5a7   : > { %v2609_v40 = vrot.slane %v2595_v51, %v4304_v26  ;;  %v2641_v42 = vrot.slane %v2627_v36, %v4304_v26  ;;  %v4653_v45 = vrot.slane %v2594_v37, %v4304_v26  ;;  %v4656_v46 = vrot.slane %v2626_v38, %v4304_v26 }
 0x5a8   : > { %3281 = vmatpush3.bf16.msra.mxu0 %v2729_v11 }
 0x5a9   : > { %v2660_v50 = vcombine.low %v2609_v40, %v2641_v42  ;;  %v2659_v41 = vcombine.high %v4653_v45, %v4656_v46  ;;  %v2661_v53 = vcombine.high %v2609_v40, %v2641_v42  ;;  %v2658_v49 = vcombine.low %v4653_v45, %v4656_v46  ;;  %3282 = vmatprep.subr.bf16.mxu0 %v3847_v0 }
 0x5ab   : > { %2671 = vrot.lane.b32.xlu1 %v2660_v50, %s3854_s23  ;;  %2667 = vrot.lane.b32.xlu0 %v2659_v41, %s3856_s22 }
 0x5ac   : > { %3283 = vmatpush3.bf16.msra.mxu0 %v2730_v43 }
 0x5af   : > { %2675 = vrot.lane.b32.xlu1 %v2661_v53, %s3855_s12 }
 0x5b2   : > { %v2250_v58 = vpop.f32.mrb[16].mxu0  ;;  %v2296_v59 = vpop.f32.mrb[40].mxu1 }
 0x5b3   : > { %v3248_v60 = vpop.f32.mrb[17].mxu0  ;;  %v3254_v61 = vpop.f32.mrb[41].mxu1 }
 0x5b4   : > { %v2253_v63 = vpop.f32.mrb[18].mxu0  ;;  %v2299_v25 = vpop.f32.mrb[42].mxu1 }
 0x5b5   : > { %v3249_v1 = vpop.f32.mrb[19].mxu0  ;;  %v3255_v2 = vpop.f32.mrb[43].mxu1 }
 0x5d2   : > { %v2388_v5 = vpop.f32.mrb[44].mxu1 }
 0x5d3   : > { %v2442_v6 = vcombine.low %v2296_v59, %v2388_v5  ;;  %v2443_v13 = vcombine.high %v2296_v59, %v2388_v5  ;;  %v3266_v7 = vpop.f32.mrb[45].mxu1 }
 0x5d4   : > { %v2391_v14 = vpop.f32.mrb[46].mxu1 }
 0x5d5   : > { %v3267_v4 = vpop.f32.mrb[47].mxu1  ;;  %v2450_v20 = vrot.slane %v2442_v6, %v4300_v17  ;;  %v2457_v21 = vrot.slane %v2443_v13, %v4300_v17 }
 0x5da   : > { %v2342_v15 = vpop.f32.mrb[20].mxu0 }
 0x5db   : > { %v2426_v16 = vcombine.low %v2250_v58, %v2342_v15  ;;  %v2427_v30 = vcombine.high %v2250_v58, %v2342_v15  ;;  %v3260_v52 = vpop.f32.mrb[21].mxu0 }
 0x5dc   : > { %v2345_v18 = vpop.f32.mrb[22].mxu0 }
 0x5dd   : > { %v2434_v22 = vrot.slane %v2426_v16, %v4300_v17  ;;  %v2441_v23 = vrot.slane %v2427_v30, %v4300_v17  ;;  %v3261_v24 = vpop.f32.mrb[23].mxu0 }
 0x5df   : > { %v2490_v10 = vcombine.low %v2434_v22, %v2450_v20  ;;  %v2491_v27 = vcombine.high %v2434_v22, %v2450_v20  ;;  %v2506_v19 = vcombine.low %v2441_v23, %v2457_v21  ;;  %v2507_v9 = vcombine.high %v2441_v23, %v2457_v21 }
 0x5e1   : > { %v2498_v31 = vrot.slane %v2490_v10, %v4304_v26  ;;  %v2505_v34 = vrot.slane %v2491_v27, %v4304_v26  ;;  %v2514_v35 = vrot.slane %v2506_v19, %v4304_v26  ;;  %v2521_v44 = vrot.slane %v2507_v9, %v4304_v26 }
 0x5e3   : > { %v3086_v12 = vcombine.low %v2498_v31, %v2505_v34  ;;  %v3088_v51 = vcombine.high %v2498_v31, %v2505_v34  ;;  %v3090_v36 = vcombine.low %v2514_v35, %v2521_v44  ;;  %v3092_v37 = vcombine.high %v2514_v35, %v2521_v44 }
 0x5e5   : > { %v2545_v38 = vrot.slane %v3086_v12, %v4300_v17  ;;  %v2561_v39 = vrot.slane %v3088_v51, %v4300_v17  ;;  %v2577_v40 = vrot.slane %v3090_v36, %v4300_v17  ;;  %v2593_v42 = vrot.slane %v3092_v37, %v4300_v17 }
 0x5e7   : > { %v2610_v50 = vcombine.low %v2545_v38, %v2561_v39  ;;  %v2642_v41 = vcombine.low %v2577_v40, %v2593_v42  ;;  %v2611_v53 = vcombine.high %v2545_v38, %v2561_v39  ;;  %v2643_v54 = vcombine.high %v2577_v40, %v2593_v42 }
 0x5e9   : > { %v2618_v55 = vrot.slane %v2610_v50, %v4304_v26  ;;  %v2650_v56 = vrot.slane %v2642_v41, %v4304_v26  ;;  %v2625_v8 = vrot.slane %v2611_v53, %v4304_v26  ;;  %v2657_v57 = vrot.slane %v2643_v54, %v4304_v26 }
 0x5eb   : > { %v2663_v58 = vcombine.high %v2618_v55, %v2650_v56  ;;  %v2662_v17 = vcombine.low %v2618_v55, %v2650_v56  ;;  %v2665_v59 = vcombine.high %v2625_v8, %v2657_v57  ;;  %v2664_v0 = vcombine.low %v2625_v8, %v2657_v57 }
 0x5ed   : > { %2683 = vrot.lane.b32.xlu1 %v2663_v58, %s3851_s28  ;;  %2679 = vrot.lane.b32.xlu0 %v2662_v17, %s3853_s17  ;;  %s3859_s28 = smov [#allocation17]  }
 0x5f1   : > { %2691 = vrot.lane.b32.xlu1 %v2665_v59, %s3850_s15  ;;  %2687 = vrot.lane.b32.xlu0 %v2664_v0, %s3852_s6  ;;  %s3699_s15 = scalar_lea.vmem %s4704_s29, 1024  ;;  %s3703_s6 = sshll.u32 %s3859_s28, 4  ;;  %s3704_s6 = int_to_ptr.vmem [resolvable:$false] %s3703_s6 }
 0x5f2   : > { %p3700_p4 = scmp.ne.s32.totalorder %s4704_s29, %s3699_s15  ;;  %s3705_s17 = scalar_lea.vmem %s3704_s6, 2048 }
 0x5f3   : > { %p3706_p3 = scmp.lt.s32.totalorder %s4704_s29, %s3704_s6  ;;  %p3707_p2 = scmp.lt.s32.totalorder %s3705_s17, %s3699_s15 }
 0x5f4   : > { %p3701_p0 = pnand %p3700_p4, %p4839_p9 }
 0x5f5   : > { %p3708_p10 = por %p3707_p2, %p3706_p3 }
 0x5f6   : > { %p3702_p7 = pneg %p3701_p0 }
 0x5f8   : > { %p3709_p11 = pnand %p3708_p10, %p3702_p7 }
 0x61d   : > { %v2672_v60 = vpop.permute.xlu1 %2671  ;;  %v2668_v61 = vpop.permute.xlu0 %2667 }
 0x61e   : > { %v2694_v26 = vsel %vm1551_vm2, %v2658_v49, %v2668_v61 }
 0x61f   : > { %v2696_v63 = vsel %vm2695_vm5, %v2694_v26, %v2672_v60 }
 0x621   : > { %v2676_v62 = vpop.permute.xlu1 %2675 }
 0x622   : > { %v2698_v25 = vsel %vm2697_vm6, %v2696_v63, %v2676_v62 }
 0x65f   : > { %v2684_v32 = vpop.permute.xlu1 %2683  ;;  %v2680_v33 = vpop.permute.xlu0 %2679 }
 0x660   : > { %v2699_v1 = vsel %vm608_vm1, %v2698_v25, %v2680_v33 }
 0x661   : > { %v2701_v45 = vsel %vm2700_vm7, %v2699_v1, %v2684_v32 }
 0x663   : > { %v2692_v2 = vpop.permute.xlu1 %2691  ;;  %v2688_v46 = vpop.permute.xlu0 %2687 }
 0x664   : > { %v2703_v49 = vsel %vm2702_vm8, %v2701_v45, %v2688_v46 }
 0x665   : > { %v2705_v3 = vsel %vm2704_vm9, %v2703_v49, %v2692_v2 }
 0x666   : > { %v2706_v5 = vpack.c.bf16 %v2705_v3, %v2705_v3 }
 0x668   : > { %3285 = vmatmul.mubr.bf16.vlgmr.msra.gmra.mrb[24].mxu0 %v2706_v5 }
 0x669   : > { %3712 = shalt.err (!%p3709_p11)
}
 0x66a   : > { %s3713_s23 = scalar_lea.hbm %s4702_s19, 1024  ;;  %s3717_s5 = scalar_lea.hbm %s4838_s16, 2048 }
 0x66b   : > { %p3714_p5 = scmp.ne.s32.totalorder %s4702_s19, %s3713_s23  ;;  %p3718_p12 = scmp.lt.u32.totalorder %s4702_s19, %s4838_s16 }
 0x66c   : > { %p3719_p6 = scmp.lt.u32.totalorder %s3717_s5, %s3713_s23  ;;  %p3721_p4 = scmp.lt.u32.totalorder %s3713_s23, %s4702_s19 }
 0x66d   : > { %p3715_p8 = pnand %p3714_p5, %p4839_p9 }
 0x66e   : > { %p3720_p13 = por %p3719_p6, %p3718_p12 }
 0x66f   : > { %p3716_p1 = pneg %p3715_p8 }
 0x670   : > { %p3722_p0 = por %p3721_p4, %p3720_p13 }
 0x672   : > { %p3723_p7 = pnand %p3722_p0, %p3716_p1 }
 0x674   : > { %3726 = shalt.err (!%p3723_p7)
}
 0x675   : > { %s3860_s27 = smov 128   ;;  %s3861_s25 = smov 8   ;;  %v3093_v6 = vld [vmem:[#allocation14] ss:$0 sm:$0xff] }
 0x676   : > { %3317 = dma.vmem_to_hbm [thread:$0]  (%p4839_p9), %s4704_s29, 1024, %s4702_s19, %s2793_s21, %s3860_s27, %s3860_s27, %s3861_s25  }
 0x677   : > { %s3096_s15 = sshll.u32 %s4837_s26, 7  ;;  %s488_s28 = scalar_lea.vmem [#allocation16], %s4218_s4 }
 0x678   : > { %s2807_s6 = sshll.u32 %s488_s28, 4  ;;  %s4840_s12 = sld [smem:[#allocation33_spill]]  ;;  %s4737_s6 = int_to_ptr.vmem [resolvable:$true] %s2807_s6 }
 0x679   : > { %s2788_s29 = scalar_lea.sflag [#allocation4], %s4215_s3  ;;  %s3727_s26 = scalar_lea.vmem %s4737_s6, 128 }
 0x67a   : > { %p3728_p3 = scmp.ne.s32.totalorder %s4737_s6, %s3727_s26  ;;  %s3862_s4 = smov [#allocation16]  }
 0x67b   : > { %s3731_s19 = sshll.u32 %s3862_s4, 4  ;;  %s3732_s19 = int_to_ptr.vmem [resolvable:$false] %s3731_s19 }
 0x67c   : > { %p3729_p2 = pnand %p3728_p3, %p4839_p9  ;;  %s3733_s21 = scalar_lea.vmem %s3732_s19, 256 }
 0x67d   : > { %p3734_p11 = scmp.lt.s32.totalorder %s4737_s6, %s3732_s19  ;;  %p3735_p5 = scmp.lt.s32.totalorder %s3733_s21, %s3727_s26 }
 0x67e   : > { %s4841_s22 = smov %s4840_s12  ;;  %s4735_s5 = scalar_lea.hbm %s4840_s12, %s3096_s15 }
 0x67f   : > { %p3730_p10 = pneg %p3729_p2  ;;  %p3736_p8 = por %p3735_p5, %p3734_p11 }
 0x681   : > { %p3737_p1 = pnand %p3736_p8, %p3730_p10 }
 0x73b   : > { %v2772_v13 = vpop.f32.mrb[24].mxu0 }
 0x73c   : > { %v2773_v7 = vadd.f32 %v3093_v6, %v2772_v13  ;;  %v3286_v14 = vpop.f32.mrb[25].mxu0 }
 0x73d   : > { %v2775_v4 = vpop.f32.mrb[26].mxu0 }
 0x73e   : > { %2778 = vst [vmem:[%s488_s28] sm:$0xff] %v2773_v7  ;;  %v3287_v15 = vpop.f32.mrb[27].mxu0 }
 0x73f   : > { %3740 = shalt.err (!%p3737_p1)
}
 0x740   : > { %s3741_s3 = scalar_lea.hbm %s4735_s5, 128  ;;  %s3745_s27 = scalar_lea.hbm %s4841_s22, 256 }
 0x741   : > { %p3742_p12 = scmp.ne.s32.totalorder %s4735_s5, %s3741_s3  ;;  %p3746_p4 = scmp.lt.u32.totalorder %s4735_s5, %s4841_s22 }
 0x742   : > { %p3747_p0 = scmp.lt.u32.totalorder %s3745_s27, %s3741_s3  ;;  %p3749_p3 = scmp.lt.u32.totalorder %s3741_s3, %s4735_s5 }
 0x743   : > { %p3743_p6 = pnand %p3742_p12, %p4839_p9 }
 0x744   : > { %p3748_p7 = por %p3747_p0, %p3746_p4 }
 0x745   : > { %p3744_p13 = pneg %p3743_p6 }
 0x746   : > { %p3750_p2 = por %p3749_p3, %p3748_p7 }
 0x748   : > { %p3751_p10 = pnand %p3750_p2, %p3744_p13 }
 0x74a   : > { %3754 = shalt.err (!%p3751_p10)
}
 0x74b   : > { %3316 = dma.vmem_to_hbm [thread:$0]  (%p4839_p9), %s4737_s6, 128, %s4735_s5, %s2788_s29  }
 0x74c PF: > { %s2836_s28 = sand.u32 1, %s3813_s30   ;;  %p4842_p11 = scmp.ne.s32.totalorder %s4825_s8, 0 }
 0x74d   : > { %p4843_p5 = scmp.ge.s32.totalorder %s3833_s14, 2  ;;  %s2837_s17 = scalar_lea.sflag [#allocation4], %s2836_s28 }
 0x74f   : > { %p3347_p8 = pnand %p4843_p5, %p4842_p11 }
 0x751   : > { %3804 = dma.done.wait (!%p3347_p8), %s2837_s17, 128  }
 0x752   : > { %3806 = vsyncadd (!%p3347_p8), %s2837_s17, 4294967168  ;;  %s2846_s23 = scalar_lea.sflag [#allocation18], %s2836_s28 }
 0x753   : > { %3808 = dma.done.wait (!%p3347_p8), %s2846_s23, 1024  }
 0x754   : > { %3810 = vsyncadd (!%p3347_p8), %s2846_s23, 4294966272  ;;  %s35_s14 = sadd.s32 1, %s3833_s14   ;;  %s4844_s30 = smov %s3817_s10 }
 0x755   : > { %p32_p1 = scmp.ge.s32.totalorder %s35_s14, 4   ;;  %s4845_s10 = smov %s3821_s11 }
 0x756   : > { %s4846_s11 = smov %s4136_s18  ;;  %s4847_s12 = smov %s3829_s13 }
 0x757   : > { %s4848_s13 = smov %s4850_s9  ;;  %34 = sbr.rel (!%p32_p1) target bundleno = 21 (0x15), region = 151 }
 0x75e   :  { %2851 = vsyncpa [#allocation3], 1 }
 0x75f   :  { %2853 = vsyncpa [#allocation3 + $0x1], 1 }
 0x760   :  { %2854 = vsyncpa [#allocation6], 1 }
 0x761   :  { %2856 = vsyncpa [#allocation6 + $0x1], 1 }
 0x762   :  { %2857 = vsyncpa [#allocation9], 1 }
 0x763   :  { %2858 = vsyncpa [#allocation12], 1 }
 0x764   :  { %2859 = vsyncpa [#allocation15], 1 }
 0x765   :  { %2860 = vsyncpa [#allocation4], 1 }
 0x766   :  { %2862 = vsyncpa [#allocation4 + $0x1], 1 }
 0x767   :  { %2863 = vsyncpa [#allocation18], 1 }
 0x768   :  { %2865 = vsyncpa [#allocation18 + $0x1], 1 }

</bundles_post_ra>
